<compile_context>
chip_gen: v6e
topology: v6e:2x2x1
jax: 0.10.0
libtpu: 0.0.40
codegen_flags: <defaults>
</compile_context>

<pallas_src>
import functools

import jax
import jax.numpy as jnp
from jax.experimental import pallas as pl
from jax.experimental.pallas import tpu as pltpu


def _rdab_kernel(Bb, H, W, C,
                 x_ref, w1_ref, b1_ref, w2_ref, b2_ref,
                 caw1_ref, cab1_ref, caw2_ref, cab2_ref,
                 wsa_ref, sab_ref, wcomp_ref, cb_ref,
                 out_ref, pad_ref):
    f32, bf16 = jnp.float32, jnp.bfloat16
    WC = W * C
    N = Bb * H

    # Re-zero only the two halo rows (top/bottom) of the shared staging buffer.
    # Done every step (NOT under @pl.when(pid == 0)) so it stays correct when
    # the "parallel" batch axis is sharded across TensorCores (per-core scratch
    # is uninitialized on a core's first iteration).
    pad_ref[:, 0:1, :] = jnp.zeros((Bb, 1, 2 * WC), f32)
    pad_ref[:, H + 1:H + 2, :] = jnp.zeros((Bb, 1, 2 * WC), f32)

    def conv3x3(w_ref, b_ref):
        # 3 accumulating (N, W*C) @ (W*C, W*C) bf16 MXU matmuls; the dx taps and
        # the zero padding along W live in the banded weights, so there are no
        # lane-axis concatenations or per-tap masked slices at all.
        acc = jnp.zeros((N, WC), f32)
        for dy in range(3):
            tap = pad_ref[:, dy:dy + H, 0:WC].reshape(N, WC).astype(bf16)
            acc = acc + jnp.dot(tap, w_ref[dy], preferred_element_type=f32)
        return acc + b_ref[...]                                   # (N, WC) f32

    # ---- conv_module: conv3x3 -> ReLU -> conv3x3 (lane-dense rows) ----------
    pad_ref[:, 1:H + 1, 0:WC] = x_ref[...]
    h1 = jnp.maximum(conv3x3(w1_ref, b1_ref), 0.0)
    pad_ref[:, 1:H + 1, 0:WC] = h1.reshape(Bb, H, WC)
    conv = conv3x3(w2_ref, b2_ref)                                # (N, WC) f32
    conv3 = conv.reshape(Bb, H, WC)

    # ---- channel attention: GAP -> 1x1 -> ReLU -> 1x1 -> sigmoid ------------
    # (the GAP gather over W and the broadcast back over W were folded into the
    #  FC weights in the wrapper -> everything stays lane-dense, f32, tiny)
    pooled_sum = jnp.sum(conv3, axis=1)                           # (Bb, WC)
    hca = jnp.maximum(
        jnp.dot(pooled_sum, caw1_ref[...], preferred_element_type=f32)
        + cab1_ref[...], 0.0)                                     # (Bb, C//r)
    s_lane = jnp.dot(hca, caw2_ref[...],
                     preferred_element_type=f32) + cab2_ref[...]  # (Bb, WC)
    ca_lane = conv3 * jax.nn.sigmoid(s_lane)[:, None, :]          # (Bb, H, WC)

    # ---- spatial attention ---------------------------------------------------
    # Per-pixel channel max: log2(C) doubling passes of lane rolls (XLU); lane
    # w*C of each pixel ends up holding max_c conv[..., w, c].  Other lanes are
    # don't-care (their SA weight rows are zero).  The rotate direction is
    # resolved at runtime with an iota probe so the result is correct under
    # either rotate convention.
    lane_iota = jax.lax.broadcasted_iota(jnp.int32, (1, 1, WC), 2)
    plus_is_fwd = pltpu.roll(lane_iota, shift=1, axis=2)[:, :, 0:1] == 1

    def group_windowed_max(fwd_shift):
        m = conv3
        win = 1
        while win < C:
            s = min(win, C - win)
            m = jnp.maximum(m, pltpu.roll(m, shift=fwd_shift(s), axis=2))
            win += s
        return m

    wm_plus = group_windowed_max(lambda s: s)
    wm_minus = group_windowed_max(lambda s: WC - s)
    winmax = jnp.where(plus_is_fwd, wm_plus, wm_minus)            # (Bb, H, WC)

    # Stage [conv | winmax] rows; the per-pixel channel-mean (ones/C blocks),
    # the anchor-lane max selection, the dx taps and the zero padding are all
    # folded into the banded SA weights -> 3 accumulating f32 matmuls.
    pad_ref[:, 1:H + 1, 0:WC] = conv3
    pad_ref[:, 1:H + 1, WC:2 * WC] = winmax
    att_acc = jnp.zeros((N, WC), f32)
    for dy in range(3):
        tap = pad_ref[:, dy:dy + H, :].reshape(N, 2 * WC)
        att_acc = att_acc + jnp.dot(tap, wsa_ref[dy],
                                    preferred_element_type=f32)
    att = jax.nn.sigmoid(att_acc + sab_ref[0, 0]).reshape(Bb, H, WC)
    sa_lane = conv3 * att

    # ---- compress: two accumulating block-diagonal 1x1 matmuls + residual ---
    da = jnp.dot(ca_lane.reshape(N, WC).astype(bf16), wcomp_ref[0],
                 preferred_element_type=f32)
    da = da + jnp.dot(sa_lane.reshape(N, WC).astype(bf16), wcomp_ref[1],
                      preferred_element_type=f32)
    da = da + cb_ref[...]
    out_ref[...] = x_ref[...] + da.reshape(Bb, H, WC)   # re-read x (not held live)


def rdab_pallas(x, params, *, batch_block=None, vmem_limit_bytes=None):
    """x: (B, H, W, C) float32 NHWC.  Returns (B, H, W, C) float32."""
    B, H, W, C = x.shape
    (w1, b1, w2, b2, caw1, cab1, caw2, cab2, saw, sab, cwa, cwb, cb) = params
    CR = caw1.shape[1]
    WC = W * C
    f32, bf16 = jnp.float32, jnp.bfloat16

    # ---- one-off wrapper-side weight repacks (lane-dense banded forms) -------
    def shift_eye(dx):
        # ones at [w+dx, w]  (absent rows encode the zero padding along W)
        return jnp.eye(W, k=-dx, dtype=f32)

    def banded_conv(w9):
        mats = []
        for dy_idx in range(3):
            m = jnp.zeros((WC, WC), f32)
            for dx_idx in range(3):
                m = m + jnp.kron(shift_eye(dx_idx - 1), w9[dy_idx * 3 + dx_idx])
            mats.append(m)
        return jnp.stack(mats)                                   # (3, WC, WC)

    w1_b = banded_conv(w1).astype(bf16)
    w2_b = banded_conv(w2).astype(bf16)

    # Spatial-attention 3x3 conv (2 in-ch -> 1) as banded matrices acting on
    # [conv | winmax] rows; output replicated across each pixel's C lanes.
    ones_cc = jnp.ones((C, C), f32)
    sel_max = jnp.zeros((C, C), f32).at[0, :].set(1.0)           # read anchor lane
    sa_mats = []
    for dy_idx in range(3):
        mean_m = jnp.zeros((WC, WC), f32)
        max_m = jnp.zeros((WC, WC), f32)
        for dx_idx in range(3):
            k = dy_idx * 3 + dx_idx
            e = shift_eye(dx_idx - 1)
            mean_m = mean_m + jnp.kron(e, ones_cc * (saw[k, 0] / C))
            max_m = max_m + jnp.kron(e, sel_max * saw[k, 1])
        sa_mats.append(jnp.concatenate([mean_m, max_m], axis=0))
    wsa = jnp.stack(sa_mats)                                     # (3, 2WC, WC) f32

    # Channel attention: fold GAP gather / lane broadcast into the FC weights.
    caw1_l = jnp.kron(jnp.ones((W, 1), f32), caw1) / float(H * W)  # (WC, CR)
    caw2_l = jnp.tile(caw2, (1, W))                                # (CR, WC)
    cab2_l = jnp.tile(cab2, (1, W))                                # (1, WC)

    # Compress 1x1 as two block-diagonal matmuls (no lane concat in-kernel).
    wcomp = jnp.stack([jnp.kron(jnp.eye(W, dtype=f32), cwa),
                       jnp.kron(jnp.eye(W, dtype=f32), cwb)]).astype(bf16)
    b1_l = jnp.tile(b1, (1, W))
    b2_l = jnp.tile(b2, (1, W))
    cb_l = jnp.tile(cb, (1, W))

    x_l = x.reshape(B, H, WC)

    # ---- pick batch block: amortize per-step overhead, keep grid >= 2 so the
    # "parallel" axis can shard across v7x's two TensorCores, stay inside VMEM.
    per_img_bytes = (4 * H * WC + (H + 2) * 2 * WC + 12 * H * WC) * 4
    if batch_block is None:
        cap = max(1, (24 * 2 ** 20) // per_img_bytes)
        batch_block = 1
        for d in range(1, B + 1):
            if B % d == 0 and d <= cap and (B // d >= 2 or B == 1):
                batch_block = d
    Bb = int(batch_block)
    assert B % Bb == 0, "batch_block must divide the batch"

    if vmem_limit_bytes is None:
        weight_bytes = ((w1_b.size + w2_b.size + wcomp.size) * 2
                        + wsa.size * 4
                        + (b1_l.size + b2_l.size + caw1_l.size + caw2_l.size
                           + cab1.size + cab2_l.size + cb_l.size) * 4)
        est = 2 * weight_bytes + Bb * per_img_bytes
        # explicit scoped-VMEM budget: above the 32 MiB default when useful,
        # but always below v7x's 64 MiB physical VMEM per TensorCore.
        vmem_limit_bytes = int(min(48 * 2 ** 20, max(32 * 2 ** 20, 2 * est)))

    def wspec(shape):
        n = len(shape)
        return pl.BlockSpec(shape, lambda b, _n=n: (0,) * _n)

    smem_spec = pl.BlockSpec(memory_space=pltpu.MemorySpace.SMEM)

    grid_spec = pltpu.PrefetchScalarGridSpec(
        num_scalar_prefetch=0,
        grid=(B // Bb,),
        in_specs=[
            pl.BlockSpec((Bb, H, WC), lambda b: (b, 0, 0)),   # x (lane-dense)
            wspec((3, WC, WC)), wspec((1, WC)),               # conv1 banded (bf16)
            wspec((3, WC, WC)), wspec((1, WC)),               # conv2 banded (bf16)
            wspec((WC, CR)), wspec((1, CR)),                  # CA fc1 (GAP folded)
            wspec((CR, WC)), wspec((1, WC)),                  # CA fc2 (broadcast folded)
            wspec((3, 2 * WC, WC)),                           # SA banded (f32)
            smem_spec,                                        # SA bias scalar
            wspec((2, WC, WC)), wspec((1, WC)),               # compress block-diag
        ],
        out_specs=pl.BlockSpec((Bb, H, WC), lambda b: (b, 0, 0)),
        scratch_shapes=[
            # shared zero-halo staging: [conv input/output | SA winmax]
            pltpu.VMEM((Bb, H + 2, 2 * WC), jnp.float32),
        ],
    )

    kernel = functools.partial(_rdab_kernel, Bb, H, W, C)
    out = pl.pallas_call(
        kernel,
        out_shape=jax.ShapeDtypeStruct((B, H, WC), jnp.float32),
        grid_spec=grid_spec,
        compiler_params=pltpu.CompilerParams(
            dimension_semantics=("parallel",),
            vmem_limit_bytes=vmem_limit_bytes),
    )(x_l, w1_b, b1_l, w2_b, b2_l, caw1_l, cab1, caw2_l, cab2_l,
      wsa, sab, wcomp, cb_l)
    return out.reshape(B, H, W, C)


def rdab_ref(x, params):
    """Pure-JAX f32 reference with identical semantics (for validation)."""
    (w1, b1, w2, b2, caw1, cab1, caw2, cab2, saw, sab, cwa, cwb, cb) = params
    B, H, W, C = x.shape
    hp = jax.lax.Precision.HIGHEST

    def conv3x3(inp, w9, bias):
        p = jnp.pad(inp, ((0, 0), (1, 1), (1, 1), (0, 0)))
        out = jnp.zeros(inp.shape[:-1] + (w9.shape[-1],), jnp.float32)
        for k in range(9):
            dy, dx = divmod(k, 3)
            out = out + jnp.einsum('bhwc,cd->bhwd',
                                   p[:, dy:dy + H, dx:dx + W, :], w9[k],
                                   precision=hp)
        return out + bias

    conv_out = conv3x3(jnp.maximum(conv3x3(x, w1, b1), 0.0), w2, b2)

    pooled = jnp.mean(conv_out, axis=(1, 2), keepdims=True)
    h = jnp.maximum(jnp.einsum('bijc,cd->bijd', pooled, caw1, precision=hp) + cab1, 0.0)
    s = jax.nn.sigmoid(jnp.einsum('bijd,dc->bijc', h, caw2, precision=hp) + cab2)
    ca_out = conv_out * s

    ch_mean = jnp.mean(conv_out, axis=-1, keepdims=True)
    ch_max = jnp.max(conv_out, axis=-1, keepdims=True)
    comb = jnp.concatenate([ch_mean, ch_max], axis=-1)
    pc = jnp.pad(comb, ((0, 0), (1, 1), (1, 1), (0, 0)))
    att = jnp.zeros((B, H, W), jnp.float32)
    for k in range(9):
        dy, dx = divmod(k, 3)
        att = att + pc[:, dy:dy + H, dx:dx + W, 0] * saw[k, 0]
        att = att + pc[:, dy:dy + H, dx:dx + W, 1] * saw[k, 1]
    att = jax.nn.sigmoid(att + sab[0, 0])[..., None]
    sa_out = conv_out * att

    da = (jnp.einsum('bhwc,cd->bhwd', ca_out, cwa, precision=hp)
          + jnp.einsum('bhwc,cd->bhwd', sa_out, cwb, precision=hp) + cb)
    return x + da


if __name__ == "__main__":
    B, H, W, C, R = 4, 16, 16, 8, 4          # W*C = 128 lanes (lane-dense rows)
    CR = C // R
    f32 = jnp.float32
    key = jax.random.PRNGKey(0)
    ks = jax.random.split(key, 16)

    x = jax.random.normal(ks[0], (B, H, W, C), f32)
    params = (
        0.1 * jax.random.normal(ks[1], (9, C, C), f32),      # conv1 w (9,Cin,Cout)
        0.01 * jax.random.normal(ks[2], (1, C), f32),         # conv1 b
        0.1 * jax.random.normal(ks[3], (9, C, C), f32),       # conv2 w
        0.01 * jax.random.normal(ks[4], (1, C), f32),          # conv2 b
        0.1 * jax.random.normal(ks[5], (C, CR), f32),          # CA fc1 w
        0.01 * jax.random.normal(ks[6], (1, CR), f32),         # CA fc1 b
        0.1 * jax.random.normal(ks[7], (CR, C), f32),          # CA fc2 w
        0.01 * jax.random.normal(ks[8], (1, C), f32),          # CA fc2 b
        0.1 * jax.random.normal(ks[9], (9, 2), f32),           # SA conv w (9, 2 in-ch)
        0.01 * jax.random.normal(ks[10], (1, 1), f32),         # SA conv b
        0.1 * jax.random.normal(ks[11], (C, C), f32),          # compress w (ca half)
        0.1 * jax.random.normal(ks[12], (C, C), f32),          # compress w (sa half)
        0.01 * jax.random.normal(ks[13], (1, C), f32),         # compress b
    )

    out = jax.block_until_ready(rdab_pallas(x, params))   # auto batch_block -> 2
    ref = jax.block_until_ready(rdab_ref(x, params))

    assert out.shape == (B, H, W, C)
    assert bool(jnp.all(jnp.isfinite(out)))
    max_err = float(jnp.max(jnp.abs(out - ref)))
    if max_err > 3e-2:
        raise AssertionError(f"mismatch vs reference: max abs err {max_err}")
    print("KERNEL_OK")
</pallas_src>

<mosaic_0001>
module attributes {stable_mosaic.version = 11 : i64} {
  func.func @_rdab_kernel(%arg0: i32, %arg1: memref<2x16x128xf32, #tpu.memory_space<vmem>>, %arg2: memref<3x128x128xbf16, #tpu.memory_space<vmem>>, %arg3: memref<1x128xf32, #tpu.memory_space<vmem>>, %arg4: memref<3x128x128xbf16, #tpu.memory_space<vmem>>, %arg5: memref<1x128xf32, #tpu.memory_space<vmem>>, %arg6: memref<128x2xf32, #tpu.memory_space<vmem>>, %arg7: memref<1x2xf32, #tpu.memory_space<vmem>>, %arg8: memref<2x128xf32, #tpu.memory_space<vmem>>, %arg9: memref<1x128xf32, #tpu.memory_space<vmem>>, %arg10: memref<3x256x128xf32, #tpu.memory_space<vmem>>, %arg11: memref<1x1xf32, #tpu.memory_space<smem>>, %arg12: memref<2x128x128xbf16, #tpu.memory_space<vmem>>, %arg13: memref<1x128xf32, #tpu.memory_space<vmem>>, %arg14: memref<2x16x128xf32, #tpu.memory_space<vmem>>, %arg15: memref<2x18x256xf32, #tpu.memory_space<vmem>>) attributes {dimension_semantics = [#tpu.dimension_semantics<parallel>], iteration_bounds = array<i64: 2>, scalar_prefetch = 0 : i64, scratch_operands = 1 : i64, tpu.core_type = #tpu.core_type<tc>, window_params = [{transform_indices = @transform_0, window_bounds = array<i64: 2, 16, 128>}, {pipeline_mode = #tpu.pipeline_mode<synchronous>, transform_indices = @transform_1, window_bounds = array<i64: 3, 128, 128>}, {pipeline_mode = #tpu.pipeline_mode<synchronous>, transform_indices = @transform_2, window_bounds = array<i64: 1, 128>}, {pipeline_mode = #tpu.pipeline_mode<synchronous>, transform_indices = @transform_3, window_bounds = array<i64: 3, 128, 128>}, {pipeline_mode = #tpu.pipeline_mode<synchronous>, transform_indices = @transform_4, window_bounds = array<i64: 1, 128>}, {pipeline_mode = #tpu.pipeline_mode<synchronous>, transform_indices = @transform_5, window_bounds = array<i64: 128, 2>}, {pipeline_mode = #tpu.pipeline_mode<synchronous>, transform_indices = @transform_6, window_bounds = array<i64: 1, 2>}, {pipeline_mode = #tpu.pipeline_mode<synchronous>, transform_indices = @transform_7, window_bounds = array<i64: 2, 128>}, {pipeline_mode = #tpu.pipeline_mode<synchronous>, transform_indices = @transform_8, window_bounds = array<i64: 1, 128>}, {pipeline_mode = #tpu.pipeline_mode<synchronous>, transform_indices = @transform_9, window_bounds = array<i64: 3, 256, 128>}, {transform_indices = @transform_10, window_bounds = array<i64: 1, 1>}, {pipeline_mode = #tpu.pipeline_mode<synchronous>, transform_indices = @transform_11, window_bounds = array<i64: 2, 128, 128>}, {pipeline_mode = #tpu.pipeline_mode<synchronous>, transform_indices = @transform_12, window_bounds = array<i64: 1, 128>}, {transform_indices = @transform_13, window_bounds = array<i64: 2, 16, 128>}]} {
    %cst = arith.constant 0.000000e+00 : f32
    %0 = vector.broadcast %cst : f32 to vector<2x1x256xf32>
    %c0 = arith.constant 0 : index
    %c0_0 = arith.constant 0 : index
    %c0_1 = arith.constant 0 : index
    %1 = vector.load %arg15[%c0, %c0_0, %c0_1] : memref<2x18x256xf32, #tpu.memory_space<vmem>>, vector<2x1x256xf32>
    tpu.vector_store %arg15[%c0, %c0_0, %c0_1], %0 {strides = array<i32>} : memref<2x18x256xf32, #tpu.memory_space<vmem>>, vector<2x1x256xf32>,
    %cst_2 = arith.constant 0.000000e+00 : f32
    %2 = vector.broadcast %cst_2 : f32 to vector<2x1x256xf32>
    %c0_3 = arith.constant 0 : index
    %c17 = arith.constant 17 : index
    %c0_4 = arith.constant 0 : index
    %3 = vector.load %arg15[%c0_3, %c17, %c0_4] : memref<2x18x256xf32, #tpu.memory_space<vmem>>, vector<2x1x256xf32>
    tpu.vector_store %arg15[%c0_3, %c17, %c0_4], %2 {strides = array<i32>} : memref<2x18x256xf32, #tpu.memory_space<vmem>>, vector<2x1x256xf32>,
    %c0_5 = arith.constant 0 : index
    %c0_6 = arith.constant 0 : index
    %c0_7 = arith.constant 0 : index
    %4 = vector.load %arg1[%c0_5, %c0_6, %c0_7] : memref<2x16x128xf32, #tpu.memory_space<vmem>>, vector<2x16x128xf32>
    %c0_8 = arith.constant 0 : index
    %c1 = arith.constant 1 : index
    %c0_9 = arith.constant 0 : index
    %5 = vector.load %arg15[%c0_8, %c1, %c0_9] : memref<2x18x256xf32, #tpu.memory_space<vmem>>, vector<2x16x128xf32>
    tpu.vector_store %arg15[%c0_8, %c1, %c0_9], %4 {strides = array<i32>} : memref<2x18x256xf32, #tpu.memory_space<vmem>>, vector<2x16x128xf32>,
    %cst_10 = arith.constant 0.000000e+00 : f32
    %6 = vector.broadcast %cst_10 : f32 to vector<32x128xf32>
    %c0_11 = arith.constant 0 : index
    %c0_12 = arith.constant 0 : index
    %c0_13 = arith.constant 0 : index
    %7 = vector.load %arg15[%c0_11, %c0_12, %c0_13] : memref<2x18x256xf32, #tpu.memory_space<vmem>>, vector<2x16x128xf32>
    %8 = vector.shape_cast %7 : vector<2x16x128xf32> to vector<32x128xf32>
    %9 = arith.truncf %8 : vector<32x128xf32> to vector<32x128xbf16>
    %c0_14 = arith.constant 0 : index
    %c0_15 = arith.constant 0 : index
    %c0_16 = arith.constant 0 : index
    %10 = vector.load %arg2[%c0_14, %c0_15, %c0_16] : memref<3x128x128xbf16, #tpu.memory_space<vmem>>, vector<1x128x128xbf16>
    %11 = vector.shape_cast %10 : vector<1x128x128xbf16> to vector<128x128xbf16>
    %cst_17 = arith.constant dense<0.000000e+00> : vector<32x128xf32>
    %12 = tpu.matmul %9, %11, %cst_17 {dimension_numbers = #tpu.dot_dimension_numbers<[1], [0], [0], [1], [0, 0, 1, 1], [], []>} : vector<32x128xbf16>, vector<128x128xbf16>, vector<32x128xf32> -> vector<32x128xf32>
    %13 = arith.addf %6, %12 : vector<32x128xf32>
    %c0_18 = arith.constant 0 : index
    %c1_19 = arith.constant 1 : index
    %c0_20 = arith.constant 0 : index
    %14 = vector.load %arg15[%c0_18, %c1_19, %c0_20] : memref<2x18x256xf32, #tpu.memory_space<vmem>>, vector<2x16x128xf32>
    %15 = vector.shape_cast %14 : vector<2x16x128xf32> to vector<32x128xf32>
    %16 = arith.truncf %15 : vector<32x128xf32> to vector<32x128xbf16>
    %c1_21 = arith.constant 1 : index
    %c0_22 = arith.constant 0 : index
    %c0_23 = arith.constant 0 : index
    %17 = vector.load %arg2[%c1_21, %c0_22, %c0_23] : memref<3x128x128xbf16, #tpu.memory_space<vmem>>, vector<1x128x128xbf16>
    %18 = vector.shape_cast %17 : vector<1x128x128xbf16> to vector<128x128xbf16>
    %cst_24 = arith.constant dense<0.000000e+00> : vector<32x128xf32>
    %19 = tpu.matmul %16, %18, %cst_24 {dimension_numbers = #tpu.dot_dimension_numbers<[1], [0], [0], [1], [0, 0, 1, 1], [], []>} : vector<32x128xbf16>, vector<128x128xbf16>, vector<32x128xf32> -> vector<32x128xf32>
    %20 = arith.addf %13, %19 : vector<32x128xf32>
    %c0_25 = arith.constant 0 : index
    %c2 = arith.constant 2 : index
    %c0_26 = arith.constant 0 : index
    %21 = vector.load %arg15[%c0_25, %c2, %c0_26] : memref<2x18x256xf32, #tpu.memory_space<vmem>>, vector<2x16x128xf32>
    %22 = vector.shape_cast %21 : vector<2x16x128xf32> to vector<32x128xf32>
    %23 = arith.truncf %22 : vector<32x128xf32> to vector<32x128xbf16>
    %c2_27 = arith.constant 2 : index
    %c0_28 = arith.constant 0 : index
    %c0_29 = arith.constant 0 : index
    %24 = vector.load %arg2[%c2_27, %c0_28, %c0_29] : memref<3x128x128xbf16, #tpu.memory_space<vmem>>, vector<1x128x128xbf16>
    %25 = vector.shape_cast %24 : vector<1x128x128xbf16> to vector<128x128xbf16>
    %cst_30 = arith.constant dense<0.000000e+00> : vector<32x128xf32>
    %26 = tpu.matmul %23, %25, %cst_30 {dimension_numbers = #tpu.dot_dimension_numbers<[1], [0], [0], [1], [0, 0, 1, 1], [], []>} : vector<32x128xbf16>, vector<128x128xbf16>, vector<32x128xf32> -> vector<32x128xf32>
    %27 = arith.addf %20, %26 : vector<32x128xf32>
    %c0_31 = arith.constant 0 : index
    %c0_32 = arith.constant 0 : index
    %28 = vector.load %arg3[%c0_31, %c0_32] : memref<1x128xf32, #tpu.memory_space<vmem>>, vector<1x128xf32>
    %29 = vector.broadcast %28 : vector<1x128xf32> to vector<32x128xf32>
    %30 = arith.addf %27, %29 : vector<32x128xf32>
    %cst_33 = arith.constant 0.000000e+00 : f32
    %31 = vector.broadcast %cst_33 : f32 to vector<32x128xf32>
    %32 = arith.maximumf %30, %31 : vector<32x128xf32>
    %33 = vector.shape_cast %32 : vector<32x128xf32> to vector<2x16x128xf32>
    %c0_34 = arith.constant 0 : index
    %c1_35 = arith.constant 1 : index
    %c0_36 = arith.constant 0 : index
    %34 = vector.load %arg15[%c0_34, %c1_35, %c0_36] : memref<2x18x256xf32, #tpu.memory_space<vmem>>, vector<2x16x128xf32>
    tpu.vector_store %arg15[%c0_34, %c1_35, %c0_36], %33 {strides = array<i32>} : memref<2x18x256xf32, #tpu.memory_space<vmem>>, vector<2x16x128xf32>,
    %cst_37 = arith.constant 0.000000e+00 : f32
    %35 = vector.broadcast %cst_37 : f32 to vector<32x128xf32>
    %c0_38 = arith.constant 0 : index
    %c0_39 = arith.constant 0 : index
    %c0_40 = arith.constant 0 : index
    %36 = vector.load %arg15[%c0_38, %c0_39, %c0_40] : memref<2x18x256xf32, #tpu.memory_space<vmem>>, vector<2x16x128xf32>
    %37 = vector.shape_cast %36 : vector<2x16x128xf32> to vector<32x128xf32>
    %38 = arith.truncf %37 : vector<32x128xf32> to vector<32x128xbf16>
    %c0_41 = arith.constant 0 : index
    %c0_42 = arith.constant 0 : index
    %c0_43 = arith.constant 0 : index
    %39 = vector.load %arg4[%c0_41, %c0_42, %c0_43] : memref<3x128x128xbf16, #tpu.memory_space<vmem>>, vector<1x128x128xbf16>
    %40 = vector.shape_cast %39 : vector<1x128x128xbf16> to vector<128x128xbf16>
    %cst_44 = arith.constant dense<0.000000e+00> : vector<32x128xf32>
    %41 = tpu.matmul %38, %40, %cst_44 {dimension_numbers = #tpu.dot_dimension_numbers<[1], [0], [0], [1], [0, 0, 1, 1], [], []>} : vector<32x128xbf16>, vector<128x128xbf16>, vector<32x128xf32> -> vector<32x128xf32>
    %42 = arith.addf %35, %41 : vector<32x128xf32>
    %c0_45 = arith.constant 0 : index
    %c1_46 = arith.constant 1 : index
    %c0_47 = arith.constant 0 : index
    %43 = vector.load %arg15[%c0_45, %c1_46, %c0_47] : memref<2x18x256xf32, #tpu.memory_space<vmem>>, vector<2x16x128xf32>
    %44 = vector.shape_cast %43 : vector<2x16x128xf32> to vector<32x128xf32>
    %45 = arith.truncf %44 : vector<32x128xf32> to vector<32x128xbf16>
    %c1_48 = arith.constant 1 : index
    %c0_49 = arith.constant 0 : index
    %c0_50 = arith.constant 0 : index
    %46 = vector.load %arg4[%c1_48, %c0_49, %c0_50] : memref<3x128x128xbf16, #tpu.memory_space<vmem>>, vector<1x128x128xbf16>
    %47 = vector.shape_cast %46 : vector<1x128x128xbf16> to vector<128x128xbf16>
    %cst_51 = arith.constant dense<0.000000e+00> : vector<32x128xf32>
    %48 = tpu.matmul %45, %47, %cst_51 {dimension_numbers = #tpu.dot_dimension_numbers<[1], [0], [0], [1], [0, 0, 1, 1], [], []>} : vector<32x128xbf16>, vector<128x128xbf16>, vector<32x128xf32> -> vector<32x128xf32>
    %49 = arith.addf %42, %48 : vector<32x128xf32>
    %c0_52 = arith.constant 0 : index
    %c2_53 = arith.constant 2 : index
    %c0_54 = arith.constant 0 : index
    %50 = vector.load %arg15[%c0_52, %c2_53, %c0_54] : memref<2x18x256xf32, #tpu.memory_space<vmem>>, vector<2x16x128xf32>
    %51 = vector.shape_cast %50 : vector<2x16x128xf32> to vector<32x128xf32>
    %52 = arith.truncf %51 : vector<32x128xf32> to vector<32x128xbf16>
    %c2_55 = arith.constant 2 : index
    %c0_56 = arith.constant 0 : index
    %c0_57 = arith.constant 0 : index
    %53 = vector.load %arg4[%c2_55, %c0_56, %c0_57] : memref<3x128x128xbf16, #tpu.memory_space<vmem>>, vector<1x128x128xbf16>
    %54 = vector.shape_cast %53 : vector<1x128x128xbf16> to vector<128x128xbf16>
    %cst_58 = arith.constant dense<0.000000e+00> : vector<32x128xf32>
    %55 = tpu.matmul %52, %54, %cst_58 {dimension_numbers = #tpu.dot_dimension_numbers<[1], [0], [0], [1], [0, 0, 1, 1], [], []>} : vector<32x128xbf16>, vector<128x128xbf16>, vector<32x128xf32> -> vector<32x128xf32>
    %56 = arith.addf %49, %55 : vector<32x128xf32>
    %c0_59 = arith.constant 0 : index
    %c0_60 = arith.constant 0 : index
    %57 = vector.load %arg5[%c0_59, %c0_60] : memref<1x128xf32, #tpu.memory_space<vmem>>, vector<1x128xf32>
    %58 = vector.broadcast %57 : vector<1x128xf32> to vector<32x128xf32>
    %59 = arith.addf %56, %58 : vector<32x128xf32>
    %60 = vector.shape_cast %59 : vector<32x128xf32> to vector<2x16x128xf32>
    %cst_61 = arith.constant dense<0.000000e+00> : vector<2x128xf32>
    %61 = vector.multi_reduction <add>, %60, %cst_61 [1] : vector<2x16x128xf32> to vector<2x128xf32>
    %c0_62 = arith.constant 0 : index
    %c0_63 = arith.constant 0 : index
    %62 = vector.load %arg6[%c0_62, %c0_63] : memref<128x2xf32, #tpu.memory_space<vmem>>, vector<128x2xf32>
    %cst_64 = arith.constant dense<0.000000e+00> : vector<2x2xf32>
    %63 = tpu.matmul %61, %62, %cst_64 {dimension_numbers = #tpu.dot_dimension_numbers<[1], [0], [0], [1], [0, 0, 1, 1], [], []>} : vector<2x128xf32>, vector<128x2xf32>, vector<2x2xf32> -> vector<2x2xf32>
    %c0_65 = arith.constant 0 : index
    %c0_66 = arith.constant 0 : index
    %64 = vector.load %arg7[%c0_65, %c0_66] : memref<1x2xf32, #tpu.memory_space<vmem>>, vector<1x2xf32>
    %65 = vector.broadcast %64 : vector<1x2xf32> to vector<2x2xf32>
    %66 = arith.addf %63, %65 : vector<2x2xf32>
    %cst_67 = arith.constant 0.000000e+00 : f32
    %67 = vector.broadcast %cst_67 : f32 to vector<2x2xf32>
    %68 = arith.maximumf %66, %67 : vector<2x2xf32>
    %c0_68 = arith.constant 0 : index
    %c0_69 = arith.constant 0 : index
    %69 = vector.load %arg8[%c0_68, %c0_69] : memref<2x128xf32, #tpu.memory_space<vmem>>, vector<2x128xf32>
    %cst_70 = arith.constant dense<0.000000e+00> : vector<2x128xf32>
    %70 = tpu.matmul %68, %69, %cst_70 {dimension_numbers = #tpu.dot_dimension_numbers<[1], [0], [0], [1], [0, 0, 1, 1], [], []>} : vector<2x2xf32>, vector<2x128xf32>, vector<2x128xf32> -> vector<2x128xf32>
    %c0_71 = arith.constant 0 : index
    %c0_72 = arith.constant 0 : index
    %71 = vector.load %arg9[%c0_71, %c0_72] : memref<1x128xf32, #tpu.memory_space<vmem>>, vector<1x128xf32>
    %72 = vector.broadcast %71 : vector<1x128xf32> to vector<2x128xf32>
    %73 = arith.addf %70, %72 : vector<2x128xf32>
    %74 = arith.negf %73 : vector<2x128xf32>
    %75 = math.exp %74 : vector<2x128xf32>
    %cst_73 = arith.constant 1.000000e+00 : f32
    %76 = vector.broadcast %cst_73 : f32 to vector<2x128xf32>
    %77 = arith.addf %76, %75 : vector<2x128xf32>
    %78 = arith.divf %76, %77 : vector<2x128xf32>
    %79 = vector.shape_cast %78 : vector<2x128xf32> to vector<2x1x128xf32>
    %80 = vector.broadcast %79 : vector<2x1x128xf32> to vector<2x16x128xf32>
    %81 = arith.mulf %60, %80 : vector<2x16x128xf32>
    %82 = tpu.iota {dimensions = array<i32: 2>} : vector<1x1x128xi32>
    %c1_i32 = arith.constant 1 : i32
    %83 = tpu.dynamic_rotate %82 by %c1_i32 dim 2 : vector<1x1x128xi32>, i32 -> vector<1x1x128xi32>
    %84 = vector.extract_strided_slice %83 {offsets = [0, 0, 0], sizes = [1, 1, 1], strides = [1, 1, 1]} : vector<1x1x128xi32> to vector<1x1x1xi32>
    %c1_i32_74 = arith.constant 1 : i32
    %85 = vector.broadcast %c1_i32_74 : i32 to vector<1x1x1xi32>
    %86 = arith.cmpi eq, %84, %85 : vector<1x1x1xi32>
    %c1_i32_75 = arith.constant 1 : i32
    %87 = tpu.dynamic_rotate %60 by %c1_i32_75 dim 2 : vector<2x16x128xf32>, i32 -> vector<2x16x128xf32>
    %88 = arith.maximumf %60, %87 : vector<2x16x128xf32>
    %c2_i32 = arith.constant 2 : i32
    %89 = tpu.dynamic_rotate %88 by %c2_i32 dim 2 : vector<2x16x128xf32>, i32 -> vector<2x16x128xf32>
    %90 = arith.maximumf %88, %89 : vector<2x16x128xf32>
    %c4_i32 = arith.constant 4 : i32
    %91 = tpu.dynamic_rotate %90 by %c4_i32 dim 2 : vector<2x16x128xf32>, i32 -> vector<2x16x128xf32>
    %92 = arith.maximumf %90, %91 : vector<2x16x128xf32>
    %c127_i32 = arith.constant 127 : i32
    %93 = tpu.dynamic_rotate %60 by %c127_i32 dim 2 : vector<2x16x128xf32>, i32 -> vector<2x16x128xf32>
    %94 = arith.maximumf %60, %93 : vector<2x16x128xf32>
    %c126_i32 = arith.constant 126 : i32
    %95 = tpu.dynamic_rotate %94 by %c126_i32 dim 2 : vector<2x16x128xf32>, i32 -> vector<2x16x128xf32>
    %96 = arith.maximumf %94, %95 : vector<2x16x128xf32>
    %c124_i32 = arith.constant 124 : i32
    %97 = tpu.dynamic_rotate %96 by %c124_i32 dim 2 : vector<2x16x128xf32>, i32 -> vector<2x16x128xf32>
    %98 = arith.maximumf %96, %97 : vector<2x16x128xf32>
    %99 = vector.shape_cast %86 : vector<1x1x1xi1> to vector<1x1x1xi1>
    %100 = vector.broadcast %99 : vector<1x1x1xi1> to vector<2x16x128xi1>
    %101 = arith.select %100, %92, %98 : vector<2x16x128xi1>, vector<2x16x128xf32>
    %c0_76 = arith.constant 0 : index
    %c1_77 = arith.constant 1 : index
    %c0_78 = arith.constant 0 : index
    %102 = vector.load %arg15[%c0_76, %c1_77, %c0_78] : memref<2x18x256xf32, #tpu.memory_space<vmem>>, vector<2x16x128xf32>
    tpu.vector_store %arg15[%c0_76, %c1_77, %c0_78], %60 {strides = array<i32>} : memref<2x18x256xf32, #tpu.memory_space<vmem>>, vector<2x16x128xf32>,
    %c0_79 = arith.constant 0 : index
    %c1_80 = arith.constant 1 : index
    %c128 = arith.constant 128 : index
    %103 = vector.load %arg15[%c0_79, %c1_80, %c128] : memref<2x18x256xf32, #tpu.memory_space<vmem>>, vector<2x16x128xf32>
    tpu.vector_store %arg15[%c0_79, %c1_80, %c128], %101 {strides = array<i32>} : memref<2x18x256xf32, #tpu.memory_space<vmem>>, vector<2x16x128xf32>,
    %cst_81 = arith.constant 0.000000e+00 : f32
    %104 = vector.broadcast %cst_81 : f32 to vector<32x128xf32>
    %c0_82 = arith.constant 0 : index
    %c0_83 = arith.constant 0 : index
    %c0_84 = arith.constant 0 : index
    %105 = vector.load %arg15[%c0_82, %c0_83, %c0_84] : memref<2x18x256xf32, #tpu.memory_space<vmem>>, vector<2x16x256xf32>
    %106 = vector.shape_cast %105 : vector<2x16x256xf32> to vector<32x256xf32>
    %c0_85 = arith.constant 0 : index
    %c0_86 = arith.constant 0 : index
    %c0_87 = arith.constant 0 : index
    %107 = vector.load %arg10[%c0_85, %c0_86, %c0_87] : memref<3x256x128xf32, #tpu.memory_space<vmem>>, vector<1x256x128xf32>
    %108 = vector.shape_cast %107 : vector<1x256x128xf32> to vector<256x128xf32>
    %cst_88 = arith.constant dense<0.000000e+00> : vector<32x128xf32>
    %109 = tpu.matmul %106, %108, %cst_88 {dimension_numbers = #tpu.dot_dimension_numbers<[1], [0], [0], [1], [0, 0, 1, 1], [], []>} : vector<32x256xf32>, vector<256x128xf32>, vector<32x128xf32> -> vector<32x128xf32>
    %110 = arith.addf %104, %109 : vector<32x128xf32>
    %c0_89 = arith.constant 0 : index
    %c1_90 = arith.constant 1 : index
    %c0_91 = arith.constant 0 : index
    %111 = vector.load %arg15[%c0_89, %c1_90, %c0_91] : memref<2x18x256xf32, #tpu.memory_space<vmem>>, vector<2x16x256xf32>
    %112 = vector.shape_cast %111 : vector<2x16x256xf32> to vector<32x256xf32>
    %c1_92 = arith.constant 1 : index
    %c0_93 = arith.constant 0 : index
    %c0_94 = arith.constant 0 : index
    %113 = vector.load %arg10[%c1_92, %c0_93, %c0_94] : memref<3x256x128xf32, #tpu.memory_space<vmem>>, vector<1x256x128xf32>
    %114 = vector.shape_cast %113 : vector<1x256x128xf32> to vector<256x128xf32>
    %cst_95 = arith.constant dense<0.000000e+00> : vector<32x128xf32>
    %115 = tpu.matmul %112, %114, %cst_95 {dimension_numbers = #tpu.dot_dimension_numbers<[1], [0], [0], [1], [0, 0, 1, 1], [], []>} : vector<32x256xf32>, vector<256x128xf32>, vector<32x128xf32> -> vector<32x128xf32>
    %116 = arith.addf %110, %115 : vector<32x128xf32>
    %c0_96 = arith.constant 0 : index
    %c2_97 = arith.constant 2 : index
    %c0_98 = arith.constant 0 : index
    %117 = vector.load %arg15[%c0_96, %c2_97, %c0_98] : memref<2x18x256xf32, #tpu.memory_space<vmem>>, vector<2x16x256xf32>
    %118 = vector.shape_cast %117 : vector<2x16x256xf32> to vector<32x256xf32>
    %c2_99 = arith.constant 2 : index
    %c0_100 = arith.constant 0 : index
    %c0_101 = arith.constant 0 : index
    %119 = vector.load %arg10[%c2_99, %c0_100, %c0_101] : memref<3x256x128xf32, #tpu.memory_space<vmem>>, vector<1x256x128xf32>
    %120 = vector.shape_cast %119 : vector<1x256x128xf32> to vector<256x128xf32>
    %cst_102 = arith.constant dense<0.000000e+00> : vector<32x128xf32>
    %121 = tpu.matmul %118, %120, %cst_102 {dimension_numbers = #tpu.dot_dimension_numbers<[1], [0], [0], [1], [0, 0, 1, 1], [], []>} : vector<32x256xf32>, vector<256x128xf32>, vector<32x128xf32> -> vector<32x128xf32>
    %122 = arith.addf %116, %121 : vector<32x128xf32>
    %c0_103 = arith.constant 0 : index
    %c0_104 = arith.constant 0 : index
    %123 = memref.load %arg11[%c0_103, %c0_104] : memref<1x1xf32, #tpu.memory_space<smem>>
    %124 = vector.broadcast %123 : f32 to vector<32x128xf32>
    %125 = arith.addf %122, %124 : vector<32x128xf32>
    %126 = arith.negf %125 : vector<32x128xf32>
    %127 = math.exp %126 : vector<32x128xf32>
    %cst_105 = arith.constant 1.000000e+00 : f32
    %128 = vector.broadcast %cst_105 : f32 to vector<32x128xf32>
    %129 = arith.addf %128, %127 : vector<32x128xf32>
    %130 = arith.divf %128, %129 : vector<32x128xf32>
    %131 = vector.shape_cast %130 : vector<32x128xf32> to vector<2x16x128xf32>
    %132 = arith.mulf %60, %131 : vector<2x16x128xf32>
    %133 = vector.shape_cast %81 : vector<2x16x128xf32> to vector<32x128xf32>
    %134 = arith.truncf %133 : vector<32x128xf32> to vector<32x128xbf16>
    %c0_106 = arith.constant 0 : index
    %c0_107 = arith.constant 0 : index
    %c0_108 = arith.constant 0 : index
    %135 = vector.load %arg12[%c0_106, %c0_107, %c0_108] : memref<2x128x128xbf16, #tpu.memory_space<vmem>>, vector<1x128x128xbf16>
    %136 = vector.shape_cast %135 : vector<1x128x128xbf16> to vector<128x128xbf16>
    %cst_109 = arith.constant dense<0.000000e+00> : vector<32x128xf32>
    %137 = tpu.matmul %134, %136, %cst_109 {dimension_numbers = #tpu.dot_dimension_numbers<[1], [0], [0], [1], [0, 0, 1, 1], [], []>} : vector<32x128xbf16>, vector<128x128xbf16>, vector<32x128xf32> -> vector<32x128xf32>
    %138 = vector.shape_cast %132 : vector<2x16x128xf32> to vector<32x128xf32>
    %139 = arith.truncf %138 : vector<32x128xf32> to vector<32x128xbf16>
    %c1_110 = arith.constant 1 : index
    %c0_111 = arith.constant 0 : index
    %c0_112 = arith.constant 0 : index
    %140 = vector.load %arg12[%c1_110, %c0_111, %c0_112] : memref<2x128x128xbf16, #tpu.memory_space<vmem>>, vector<1x128x128xbf16>
    %141 = vector.shape_cast %140 : vector<1x128x128xbf16> to vector<128x128xbf16>
    %cst_113 = arith.constant dense<0.000000e+00> : vector<32x128xf32>
    %142 = tpu.matmul %139, %141, %cst_113 {dimension_numbers = #tpu.dot_dimension_numbers<[1], [0], [0], [1], [0, 0, 1, 1], [], []>} : vector<32x128xbf16>, vector<128x128xbf16>, vector<32x128xf32> -> vector<32x128xf32>
    %143 = arith.addf %137, %142 : vector<32x128xf32>
    %c0_114 = arith.constant 0 : index
    %c0_115 = arith.constant 0 : index
    %144 = vector.load %arg13[%c0_114, %c0_115] : memref<1x128xf32, #tpu.memory_space<vmem>>, vector<1x128xf32>
    %145 = vector.broadcast %144 : vector<1x128xf32> to vector<32x128xf32>
    %146 = arith.addf %143, %145 : vector<32x128xf32>
    %c0_116 = arith.constant 0 : index
    %c0_117 = arith.constant 0 : index
    %c0_118 = arith.constant 0 : index
    %147 = vector.load %arg1[%c0_116, %c0_117, %c0_118] : memref<2x16x128xf32, #tpu.memory_space<vmem>>, vector<2x16x128xf32>
    %148 = vector.shape_cast %146 : vector<32x128xf32> to vector<2x16x128xf32>
    %149 = arith.addf %147, %148 : vector<2x16x128xf32>
    %c0_119 = arith.constant 0 : index
    %c0_120 = arith.constant 0 : index
    %c0_121 = arith.constant 0 : index
    %150 = vector.load %arg14[%c0_119, %c0_120, %c0_121] : memref<2x16x128xf32, #tpu.memory_space<vmem>>, vector<2x16x128xf32>
    tpu.vector_store %arg14[%c0_119, %c0_120, %c0_121], %149 {strides = array<i32>} : memref<2x16x128xf32, #tpu.memory_space<vmem>>, vector<2x16x128xf32>,
    return
  }
  func.func @transform_0(%arg0: i32) -> (i32, i32, i32) {
    %c0_i32 = arith.constant 0 : i32
    %c0_i32_0 = arith.constant 0 : i32
    %c0_i32_1 = arith.constant 0 : i32
    return %arg0, %c0_i32, %c0_i32_0 : i32, i32, i32
  }
  func.func @transform_1(%arg0: i32) -> (i32, i32, i32) {
    %c0_i32 = arith.constant 0 : i32
    %c0_i32_0 = arith.constant 0 : i32
    %c0_i32_1 = arith.constant 0 : i32
    %c0_i32_2 = arith.constant 0 : i32
    return %c0_i32, %c0_i32_0, %c0_i32_1 : i32, i32, i32
  }
  func.func @transform_2(%arg0: i32) -> (i32, i32) {
    %c0_i32 = arith.constant 0 : i32
    %c0_i32_0 = arith.constant 0 : i32
    %c0_i32_1 = arith.constant 0 : i32
    return %c0_i32, %c0_i32_0 : i32, i32
  }
  func.func @transform_3(%arg0: i32) -> (i32, i32, i32) {
    %c0_i32 = arith.constant 0 : i32
    %c0_i32_0 = arith.constant 0 : i32
    %c0_i32_1 = arith.constant 0 : i32
    %c0_i32_2 = arith.constant 0 : i32
    return %c0_i32, %c0_i32_0, %c0_i32_1 : i32, i32, i32
  }
  func.func @transform_4(%arg0: i32) -> (i32, i32) {
    %c0_i32 = arith.constant 0 : i32
    %c0_i32_0 = arith.constant 0 : i32
    %c0_i32_1 = arith.constant 0 : i32
    return %c0_i32, %c0_i32_0 : i32, i32
  }
  func.func @transform_5(%arg0: i32) -> (i32, i32) {
    %c0_i32 = arith.constant 0 : i32
    %c0_i32_0 = arith.constant 0 : i32
    %c0_i32_1 = arith.constant 0 : i32
    return %c0_i32, %c0_i32_0 : i32, i32
  }
  func.func @transform_6(%arg0: i32) -> (i32, i32) {
    %c0_i32 = arith.constant 0 : i32
    %c0_i32_0 = arith.constant 0 : i32
    %c0_i32_1 = arith.constant 0 : i32
    return %c0_i32, %c0_i32_0 : i32, i32
  }
  func.func @transform_7(%arg0: i32) -> (i32, i32) {
    %c0_i32 = arith.constant 0 : i32
    %c0_i32_0 = arith.constant 0 : i32
    %c0_i32_1 = arith.constant 0 : i32
    return %c0_i32, %c0_i32_0 : i32, i32
  }
  func.func @transform_8(%arg0: i32) -> (i32, i32) {
    %c0_i32 = arith.constant 0 : i32
    %c0_i32_0 = arith.constant 0 : i32
    %c0_i32_1 = arith.constant 0 : i32
    return %c0_i32, %c0_i32_0 : i32, i32
  }
  func.func @transform_9(%arg0: i32) -> (i32, i32, i32) {
    %c0_i32 = arith.constant 0 : i32
    %c0_i32_0 = arith.constant 0 : i32
    %c0_i32_1 = arith.constant 0 : i32
    %c0_i32_2 = arith.constant 0 : i32
    return %c0_i32, %c0_i32_0, %c0_i32_1 : i32, i32, i32
  }
  func.func @transform_10(%arg0: i32) -> (i32, i32) {
    %c0_i32 = arith.constant 0 : i32
    %c0_i32_0 = arith.constant 0 : i32
    %c0_i32_1 = arith.constant 0 : i32
    return %c0_i32, %c0_i32_0 : i32, i32
  }
  func.func @transform_11(%arg0: i32) -> (i32, i32, i32) {
    %c0_i32 = arith.constant 0 : i32
    %c0_i32_0 = arith.constant 0 : i32
    %c0_i32_1 = arith.constant 0 : i32
    %c0_i32_2 = arith.constant 0 : i32
    return %c0_i32, %c0_i32_0, %c0_i32_1 : i32, i32, i32
  }
  func.func @transform_12(%arg0: i32) -> (i32, i32) {
    %c0_i32 = arith.constant 0 : i32
    %c0_i32_0 = arith.constant 0 : i32
    %c0_i32_1 = arith.constant 0 : i32
    return %c0_i32, %c0_i32_0 : i32, i32
  }
  func.func @transform_13(%arg0: i32) -> (i32, i32, i32) {
    %c0_i32 = arith.constant 0 : i32
    %c0_i32_0 = arith.constant 0 : i32
    %c0_i32_1 = arith.constant 0 : i32
    return %arg0, %c0_i32, %c0_i32_0 : i32, i32, i32
  }
}

</mosaic_0001>

<bundles_post_ra>
// kernel: tpu_custom_call.1
= control target key start
LH: loop header
LB: loop body
LE: loop exit
PB: predicated region body
PF: predicated region fallthrough
CT: control target
= control target key end

     0   :  { %s4182_s0 = inlined_call_operand.hbm [shape: f32[4,16,128], index: 0, kind: input, shape index: {}]   ;;  %s4183_s1 = inlined_call_operand.hbm [shape: bf16[3,128,128], index: 1, kind: input, shape index: {}]   ;;  %s4184_s2 = inlined_call_operand.vmem [shape: f32[1,128], index: 2, kind: input, shape index: {}]   ;;  %s4185_s3 = inlined_call_operand.hbm [shape: bf16[3,128,128], index: 3, kind: input, shape index: {}]   ;;  %s4186_s4 = inlined_call_operand.vmem [shape: f32[1,128], index: 4, kind: input, shape index: {}]   ;;  %s4187_s5 = inlined_call_operand.vmem [shape: f32[128,2], index: 5, kind: input, shape index: {}]   ;;  %s4188_s6 = inlined_call_operand.vmem [shape: f32[1,2], index: 6, kind: input, shape index: {}]   ;;  %s4189_s7 = inlined_call_operand.vmem [shape: f32[2,128], index: 7, kind: input, shape index: {}]   ;;  %s4190_s8 = inlined_call_operand.vmem [shape: f32[1,128], index: 8, kind: input, shape index: {}]   ;;  %s4191_s9 = inlined_call_operand.hbm [shape: f32[3,256,128], index: 9, kind: input, shape index: {}]   ;;  %s4192_s10 = inlined_call_operand.<no memory space> [shape: f32[1,1], index: 10, kind: input, shape index: {}]   ;;  %s4193_s11 = inlined_call_operand.vmem [shape: bf16[2,128,128], index: 11, kind: input, shape index: {}]   ;;  %s4194_s12 = inlined_call_operand.vmem [shape: f32[1,128], index: 12, kind: input, shape index: {}]   ;;  %s4195_s13 = inlined_call_operand.hbm [shape: f32[4,16,128], index: 13, kind: output, shape index: {}]  }
   0x1   :  { %4204 = sst [smem:[#allocation20_spill]] %s4183_s1 }
   0x2   :  { %4205 = sst [smem:[#allocation21_spill]] %s4185_s3 }
   0x3   :  { %4206 = sst [smem:[#allocation22_spill]] %s4191_s9 }
   0x4   :  { %18 = sst [smem:[#allocation3]] %s4192_s10 }
   0x5   :  { %19 = vsyncpa [#allocation5], 0 }
   0x6   :  { %21 = vsyncpa [#allocation5 + $0x1], 0 }
   0x7   :  { %22 = vsyncpa [#allocation8], 0 }
   0x8   :  { %23 = vsyncpa [#allocation11], 0 }
   0x9   :  { %24 = vsyncpa [#allocation6], 0 }
   0xa   :  { %26 = vsyncpa [#allocation6 + $0x1], 0  ;;  %s3637_s27 = smov 0   ;;  %s3639_s28 = smov 0  }
   0xb   :  { %s3641_s29 = smov 0   ;;  %s3643_s30 = smov 0  }
   0xc LB: > { %4207 = sst [smem:[#allocation17_spill]] %s3537_s29  ;;  %s3658_s10 = sadd.s32 4294967295, %s3541_s30   ;;  %s3541_s30 = sphi %s3643_s30, %s4238_s30   ;;  %s3537_s29 = sphi %s3641_s29, %s4235_s29   ;;  %s3533_s28 = sphi %s3639_s28, %s4237_s28   ;;  %s3529_s27 = sphi %s3637_s27, %s4236_s27  }
   0xd   : > { %s2635_s14 = sadd.s32 4294967294, %s3541_s30   ;;  %p52_p0 = scmp.ne.s32.totalorder %s3533_s28, %s3529_s27 }
   0xe   : > { %p4196_p1 = scmp.eq.s32.totalorder %s3658_s10, 0  ;;  %p334_p3 = scmp.eq.s32.totalorder %s2635_s14, 1 }
   0xf   : > { %p2636_p5 = scmp.ge.s32.totalorder %s3541_s30, 1  ;;  %p341_p7 = scmp.lt.s32.totalorder %s3541_s30, 3 }
  0x10   : > { %p3667_p4 = por %p4196_p1, %p52_p0  ;;  %p3672_p6 = por %p334_p3, %p52_p0 }
  0x11   : > { %p3677_p8 = pnand %p2636_p5, %p341_p7  ;;  %s3543_s18 = smov [#allocation7]  }
  0x12   : > { %s4208_s15 = scalar_select %p3667_p4, 1, 0 }
  0x13   : > { %s4209_s16 = scalar_select %p3672_p6, 1, 0 }
  0x14   : > { %s4211_s17 = scalar_select %p3677_p8, 1, 0 }
  0x15   : > { %4210 = sst [smem:[#allocation18_spill]] %s4209_s16  ;;  %s353_s19 = sshll.u32 %s3543_s18, 4  ;;  %s354_s19 = int_to_ptr.vmem [resolvable:$true] %s353_s19 }
  0x16   : > { %p3202_p9 = pneg %p3677_p8  ;;  %s3544_s21 = smov [#allocation9]  }
  0x17   : > { %s369_s22 = sshll.u32 %s3544_s21, 4  ;;  %s3545_s23 = smov [#allocation10]   ;;  %s370_s22 = int_to_ptr.vmem [resolvable:$true] %s369_s22 }
  0x18   : > { %p3686_p11 = pnand %p3202_p9, %p4196_p1  ;;  %s397_s24 = sshll.u32 %s3545_s23, 4  ;;  %s398_s24 = int_to_ptr.vmem [resolvable:$true] %s397_s24 }
  0x19   : > { %s3374_s25 = scalar_lea.vmem %s354_s19, 3072  ;;  %p3382_p5 = scmp.lt.s32.totalorder %s354_s19, %s354_s19 }
  0x1a   : > { %p3365_p12 = pneg %p3686_p11  ;;  %p3375_p13 = scmp.ne.s32.totalorder %s354_s19, %s3374_s25 }
  0x1b   : > { %p3383_p7 = scmp.lt.s32.totalorder %s3374_s25, %s3374_s25 }
  0x1c   : > { %p3377_p0 = pnand %p3375_p13, %p3365_p12 }
  0x1d   : > { %p3384_p9 = por %p3383_p7, %p3382_p5 }
  0x1e   : > { %p3378_p3 = pneg %p3377_p0 }
  0x20   : > { %p3385_p10 = pnand %p3384_p9, %p3378_p3 }
  0x22   : > { %3388 = shalt.err (!%p3385_p10)
}
  0x23   : > { %s3546_s26 = smov 64   ;;  %s3547_s14 = smov 4  }
  0x24   : > { %s4213_s1 = sld [smem:[#allocation20_spill]]  ;;  %s3400_s23 = scalar_lea.vmem %s370_s22, 3072 }
  0x25   : > { %p3401_p1 = scmp.ne.s32.totalorder %s370_s22, %s3400_s23  ;;  %p3408_p2 = scmp.lt.s32.totalorder %s370_s22, %s370_s22 }
  0x26   : > { %p3409_p6 = scmp.lt.s32.totalorder %s3400_s23, %s3400_s23 }
  0x27   : > { %p3403_p13 = pnand %p3401_p1, %p3365_p12 }
  0x28   : > { %p3410_p5 = por %p3409_p6, %p3408_p2 }
  0x29   : > { %p3404_p0 = pneg %p3403_p13 }
  0x2a   : > { %3205 = dma.hbm_to_vmem [thread:$0]  (!%p3686_p11), %s4213_s1, 3072, %s354_s19, [#allocation8], %s3546_s26, %s3546_s26, %s3547_s14  }
  0x2b   : > { %p3411_p3 = pnand %p3410_p5, %p3404_p0 }
  0x2d   : > { %3414 = shalt.err (!%p3411_p3)
}
  0x2e   : > { %s4214_s3 = sld [smem:[#allocation21_spill]]  ;;  %s3426_s19 = scalar_lea.vmem %s398_s24, 12288 }
  0x2f   : > { %p3427_p10 = scmp.ne.s32.totalorder %s398_s24, %s3426_s19  ;;  %p3434_p9 = scmp.lt.s32.totalorder %s398_s24, %s398_s24 }
  0x30   : > { %p3435_p13 = scmp.lt.s32.totalorder %s3426_s19, %s3426_s19 }
  0x31   : > { %p3429_p7 = pnand %p3427_p10, %p3365_p12 }
  0x32   : > { %p3436_p4 = por %p3435_p13, %p3434_p9 }
  0x33   : > { %p3430_p1 = pneg %p3429_p7 }
  0x34   : > { %3208 = dma.hbm_to_vmem [thread:$0]  (!%p3686_p11), %s4214_s3, 3072, %s370_s22, [#allocation8], %s3546_s26, %s3546_s26, %s3547_s14  }
  0x35   : > { %p3437_p2 = pnand %p3436_p4, %p3430_p1 }
  0x37   : > { %3440 = shalt.err (!%p3437_p2)
}
  0x38   : > { %s4199_s18 = smov 128   ;;  %s4200_s16 = smov 8  }
  0x39   : > { %s4215_s9 = sld [smem:[#allocation22_spill]]  ;;  %s3720_s14 = sadd.s32 1, %s3541_s30  }
  0x3a   : > { %s36_s21 = ssub.s32 %s3541_s30, %s3720_s14  ;;  %s39_s23 = sadd.s32 1, %s3537_s29 }
  0x3b   : > { %p37_p4 = scmp.eq.s32.totalorder %s36_s21, 0  ;;  %p46_p6 = scmp.ne.s32.totalorder %s3537_s29, %s3533_s28 }
  0x3c   : > { %p47_p12 = scmp.eq.s32.totalorder %s3541_s30, 0  ;;  %p3223_p0 = scmp.lt.s32.totalorder %s3541_s30, 2 }
  0x3d   : > { %s3730_s25 = scalar_select %p37_p4, %s3537_s29, %s39_s23  }
  0x3e   : > { %p48_p5 = por %p47_p12, %p46_p6  ;;  %p4217_p3 = scmp.eq.s32.totalorder %s3658_s10, 1 }
  0x3f   : > { %3211 = dma.hbm_to_vmem [thread:$0]  (!%p3686_p11), %s4215_s9, 12288, %s398_s24, [#allocation11], %s4199_s18, %s4199_s18, %s4200_s16  }
  0x40   : > { %4216 = sst [smem:[#allocation19_spill]] %s3730_s25  ;;  %p3734_p10 = por %p4217_p3, %p46_p6 }
  0x41   : > { %s420_s19 = sand.u32 1, %s3537_s29   ;;  %s2750_s22 = sshll.u32 %s3541_s30, 9 }
  0x42   : > { %s4218_s20 = scalar_select %p3734_p10, 1, 0 }
  0x43   : > { %s2641_s24 = sshll.u32 %s420_s19, 5  ;;  %s3743_s16 = scalar_lea.hbm %s4182_s0, %s2750_s22 }
  0x44   : > { %s424_s21 = scalar_lea.vmem [#allocation4], %s2641_s24  ;;  %p3745_p11 = pnand %p3223_p0, %p48_p5 }
  0x45   : > { %s432_s23 = sshll.u32 %s424_s21, 4  ;;  %s3751_s3 = scalar_lea.sflag [#allocation5], %s420_s19  ;;  %s3749_s23 = int_to_ptr.vmem [resolvable:$true] %s432_s23 }
  0x46   : > { %s3441_s9 = scalar_lea.hbm %s3743_s16, 512  ;;  %p3443_p1 = pneg %p3745_p11 }
  0x47   : > { %p3442_p7 = scmp.ne.s32.totalorder %s3743_s16, %s3441_s9  ;;  %s3446_s24 = scalar_lea.hbm %s4182_s0, 1024 }
  0x48   : > { %p3447_p2 = scmp.lt.s32.totalorder %s3743_s16, %s4182_s0  ;;  %p3448_p4 = scmp.lt.s32.totalorder %s3446_s24, %s3441_s9 }
  0x49   : > { %p3444_p9 = pnand %p3443_p1, %p3442_p7 }
  0x4a   : > { %p3449_p6 = por %p3448_p4, %p3447_p2 }
  0x4b   : > { %p3445_p13 = pneg %p3444_p9 }
  0x4d   : > { %p3450_p12 = pnand %p3449_p6, %p3445_p13 }
  0x4f   : > { %3453 = shalt.err (!%p3450_p12)
}
  0x50   : > { %s3454_s19 = scalar_lea.vmem %s3749_s23, 512  ;;  %s3550_s25 = smov [#allocation4]  }
  0x51   : > { %p3455_p0 = scmp.ne.s32.totalorder %s3749_s23, %s3454_s19  ;;  %s3459_s29 = sshll.u32 %s3550_s25, 4  ;;  %s3460_s29 = int_to_ptr.vmem [resolvable:$false] %s3459_s29 }
  0x52   : > { %s3461_s18 = scalar_lea.vmem %s3460_s29, 1024  ;;  %p3462_p7 = scmp.lt.s32.totalorder %s3749_s23, %s3460_s29 }
  0x53   : > { %p3457_p5 = pnand %p3455_p0, %p3443_p1  ;;  %p3463_p9 = scmp.lt.s32.totalorder %s3461_s18, %s3454_s19 }
  0x55   : > { %p3458_p3 = pneg %p3457_p5  ;;  %p3464_p10 = por %p3463_p9, %p3462_p7 }
  0x57   : > { %p3465_p8 = pnand %p3464_p10, %p3458_p3 }
  0x59   : > { %3468 = shalt.err (!%p3465_p8)
}
  0x5a   : > { %s4220_s9 = smov 8   ;;  %s4221_s22 = smov 128  }
  0x5b   : > { %3215 = dma.hbm_to_vmem [thread:$0]  (!%p3745_p11), %s3743_s16, 512, %s3749_s23, %s3751_s3, %s4221_s22, %s4221_s22, %s4220_s9  }
  0x5c   : > { %p4222_p1 = scmp.ne.s32.totalorder %s4211_s17, 0 }
  0x5d   : > { %s3778_s25 = sand.u32 (!%p4222_p1), 1, %s3533_s28   ;;  %p4223_p8 = scmp.ne.s32.totalorder (!%p4222_p1), %s4208_s15, 0 }
  0x5e   : > { %444 = sbr.rel (%p4222_p1) target bundleno = 1496 (0x5d8), region = 72  ;;  %s2646_s29 = sshll.u32 (!%p4222_p1), %s3778_s25, 5 }
  0x5f   : > { %s447_s24 = scalar_lea.sflag (!%p4222_p1), [#allocation5], %s3778_s25  ;;  %s3784_s1 = scalar_lea.vmem (!%p4222_p1), [#allocation4], %s2646_s29 }
  0x63   : > { %3512 = dma.done.wait (%p4223_p8), %s447_s24, 512  }
  0x64   : > { %3514 = vsyncadd (%p4223_p8), %s447_s24, 4294966784  ;;  %p4224_p10 = scmp.eq.s32.totalorder %s3658_s10, 0 }
  0x66   : > { %3516 = dma.done.wait (%p4224_p10), [#allocation8], 6144   ;;  %p4225_p11 = pmov %p4224_p10 }
  0x67   : > { %p4226_p13 = pmov %p4224_p10 }
  0x68   : > { %3518 = vsyncadd (%p4225_p11), [#allocation8], 4294961152 }
  0x69   : > { %3520 = dma.done.wait (%p4226_p13), [#allocation11], 12288   ;;  %p4227_p2 = pmov %p4224_p10 }
  0x6a   : > { %v508_v0 = vlaneseq  ;;  %v3551_v1 = vmov 0.0   ;;  %v3279_v2 = vld [vmem:[#allocation7 + $0x78] sm:$0xff]   ;;  %v3281_v4 = vld [vmem:[#allocation7 + $0x70] sm:$0xff]   ;;  %v3283_v6 = vld [vmem:[#allocation7 + $0x68] sm:$0xff]   ;;  %vm531_vm1 = vcmask 1040384   ;;  %vm582_vm2 = vcmask 1046528  }
  0x6b   : > { %3522 = vsyncadd (%p4227_p2), [#allocation11], 4294955008  ;;  %v3280_v3 = vld [vmem:[#allocation7 + $0x38] sm:$0xff]   ;;  %2984 = vmatprep.subr.bf16.mxu0 %v3279_v2  ;;  %v3282_v5 = vld [vmem:[#allocation7 + $0x30] sm:$0xff]   ;;  %vm818_vm3 = vcmask 1045504   ;;  %vm3552_vm4 = vmmov 0  }
  0x6c   : > { %vm510_vm0 = vcmp.lt.s32.totalorder %v508_v0, 256  ;;  %3004 = vmatprep.subr.bf16.mxu1 %v3280_v3  ;;  %2985 = vmatpush3.bf16.msra.mxu0 %v3279_v2  ;;  %v3284_v7 = vld [vmem:[#allocation7 + $0x28] sm:$0xff]   ;;  %v3285_v8 = vld [vmem:[#allocation7 + $0x60] sm:$0xff]   ;;  %v3287_v10 = vld [vmem:[#allocation7 + $0x58] sm:$0xff]   ;;  %s3553_s3 = smov 127   ;;  %s3554_s15 = smov 1  }
  0x6d   : > { %512 = vst.msk [vmem:[#allocation2] ss:$8 sm:$0x3] %vm510_vm0, %v3551_v1  ;;  %518 = vst.msk [vmem:[#allocation2 + $0x21] ss:$8 sm:$0x3] %vm510_vm0, %v3551_v1  ;;  %3005 = vmatpush3.bf16.msra.mxu1 %v3280_v3  ;;  %2986 = vmatprep.subr.bf16.mxu0 %v3281_v4 }
  0x6e   : > { %521 = vst.msk [vmem:[#allocation2 + $0x51] ss:$8 sm:$0x3] %vm510_vm0, %v3551_v1  ;;  %515 = vst.msk [vmem:[#allocation2 + $0x30] ss:$8 sm:$0x3] %vm510_vm0, %v3551_v1  ;;  %3006 = vmatprep.subr.bf16.mxu1 %v3282_v5 }
  0x6f   : > { %v3286_v9 = vld [vmem:[#allocation7 + $0x20] sm:$0xff]   ;;  %v3288_v11 = vld [vmem:[#allocation7 + $0x18] sm:$0xff]   ;;  %v3289_v12 = vld [vmem:[#allocation7 + $0x50] sm:$0xff]   ;;  %vm1441_vm5 = vcmask 1041409   ;;  %vm1527_vm6 = vcmask 1041408   ;;  %s3555_s23 = smov 2  }
  0x70   : > { %2987 = vmatpush3.bf16.msra.mxu0 %v3281_v4  ;;  %v3290_v13 = vld [vmem:[#allocation7 + $0x10] sm:$0xff]   ;;  %v523_v14 = vld [vmem:[%s3784_s1] sm:$0xff]  ;;  %v524_v15 = vld [vmem:[%s3784_s1 + $0x8] sm:$0xff]  ;;  %s3556_s26 = smov 126   ;;  %vm1523_vm7 = vcmask 15360   ;;  %s3557_s18 = smov 4  }
  0x71   : > { %3007 = vmatpush3.bf16.msra.mxu1 %v3282_v5  ;;  %2988 = vmatprep.subr.bf16.mxu0 %v3283_v6  ;;  %v525_v16 = vld [vmem:[%s3784_s1 + $0x10] sm:$0xff]  ;;  %v532_v17 = vrot.slane %v523_v14, 7  ;;  %v533_v18 = vrot.slane %v524_v15, 7  ;;  %v526_v19 = vld [vmem:[%s3784_s1 + $0x18] sm:$0xff]  ;;  %v3291_v22 = vld [vmem:[#allocation7 + $0x48] sm:$0xff]   ;;  %s3558_s9 = smov 124  }
  0x72   : > { %3008 = vmatprep.subr.bf16.mxu1 %v3284_v7  ;;  %v535_v20 = vrot.slane %v525_v16, 7  ;;  %v536_v21 = vrot.slane %v526_v19, 7  ;;  %v3292_v23 = vld [vmem:[#allocation7 + $0x8] sm:$0xff]   ;;  %v3293_v26 = vld [vmem:[#allocation7 + $0x40] sm:$0xff]   ;;  %v3295_v47 = vld [vmem:[#allocation7 + $0xb8] sm:$0xff]   ;;  %s2752_s17 = sshll.u32 %s3658_s10, 9 }
  0x73   : > { %544 = vst [vmem:[#allocation2] sm:$0xfe] %v532_v17  ;;  %546 = vst [vmem:[#allocation2 + $0x20] sm:$0x1] %v533_v18  ;;  %v534_v24 = vsel %vm531_vm1, %v532_v17, %v533_v18  ;;  %v3294_v27 = vld [vmem:[#allocation7] sm:$0xff]   ;;  %v3296_v54 = vld [vmem:[#allocation7 + $0xb0] sm:$0xff]  }
  0x74   : > { %2989 = vmatpush3.bf16.msra.mxu0 %v3283_v6  ;;  %547 = vst [vmem:[#allocation2 + $0x30] sm:$0xfe] %v535_v20  ;;  %549 = vst [vmem:[#allocation2 + $0x50] sm:$0x1] %v536_v21  ;;  %v3809_v25 = vsel %vm531_vm1, %v535_v20, %v536_v21  ;;  %v584_v28 = vrot.slane %v534_v24, 1  ;;  %v820_v33 = vrot.slane %v534_v24, 2 }
  0x75   : > { %3009 = vmatpush3.bf16.msra.mxu1 %v3284_v7  ;;  %2990 = vmatprep.subr.bf16.mxu0 %v3285_v8  ;;  %v589_v29 = vrot.slane %v3809_v25, 1  ;;  %v825_v43 = vrot.slane %v3809_v25, 2  ;;  %v3297_v63 = vld [vmem:[#allocation7 + $0xa8] sm:$0xff]   ;;  %v3298_v2 = vld [vmem:[#allocation7 + $0xa0] sm:$0xff]   ;;  %v3299_v3 = vld [vmem:[#allocation7 + $0x98] sm:$0xff]   ;;  %p4230_p6 = scmp.ne.s32.totalorder %s4218_s20, 0 }
  0x76   : > { %3010 = vmatprep.subr.bf16.mxu1 %v3286_v9  ;;  %v3300_v4 = vld [vmem:[#allocation7 + $0x90] sm:$0xff]   ;;  %v3301_v5 = vld [vmem:[#allocation7 + $0x88] sm:$0xff]   ;;  %v3302_v6 = vld [vmem:[#allocation7 + $0x80] sm:$0xff]   ;;  %s3561_s10 = smov [#allocation12]  }
  0x77   : > { %v3306_v14 = vld [vmem:[#allocation9 + $0x70] sm:$0xff]   ;;  %v3309_v15 = vld [vmem:[#allocation9 + $0x20] sm:$0xff]   ;;  %v3308_v16 = vld [vmem:[#allocation9 + $0x68] sm:$0xff]  }
  0x78   : > { %2991 = vmatpush3.bf16.msra.mxu0 %v3285_v8  ;;  %v3311_v17 = vld [vmem:[#allocation9 + $0x18] sm:$0xff]   ;;  %v3310_v18 = vld [vmem:[#allocation9 + $0x60] sm:$0xff]   ;;  %v3313_v19 = vld [vmem:[#allocation9 + $0x10] sm:$0xff]  }
  0x79   : > { %3011 = vmatpush3.bf16.msra.mxu1 %v3286_v9  ;;  %2992 = vmatprep.subr.bf16.mxu0 %v3287_v10  ;;  %v3312_v20 = vld [vmem:[#allocation9 + $0x58] sm:$0xff]   ;;  %v3315_v21 = vld [vmem:[#allocation9 + $0x8] sm:$0xff]  }
  0x7a   : > { %3012 = vmatprep.subr.bf16.mxu1 %v3288_v11  ;;  %v572_v30 = vld [vmem:[#allocation2] sm:$0xfe]  ;;  %v573_v31 = vld [vmem:[#allocation2 + $0x20] sm:$0x1] }
  0x7b   : > { %v550_v32 = vld [vmem:[#allocation2] sm:$0xff]  ;;  %v583_v34 = vrot.slane %v572_v30, 1  ;;  %v586_v35 = vrot.slane %v573_v31, 1  ;;  %v574_v37 = vld [vmem:[#allocation2 + $0x30] sm:$0xfe] }
  0x7c   : > { %2993 = vmatpush3.bf16.msra.mxu0 %v3287_v10  ;;  %v554_v36 = vpack.c.bf16 %v534_v24, %v550_v32  ;;  %v575_v38 = vld [vmem:[#allocation2 + $0x50] sm:$0x1]  ;;  %v588_v39 = vrot.slane %v574_v37, 1  ;;  %v810_v42 = vld [vmem:[#allocation2] sm:$0xfc]  ;;  %v3303_v10 = vld [vmem:[#allocation9 + $0x38] sm:$0xff]  }
  0x7d   : > { %3013 = vmatpush3.bf16.msra.mxu1 %v3288_v11  ;;  %2994 = vmatprep.subr.bf16.mxu0 %v3289_v12  ;;  %v591_v40 = vrot.slane %v575_v38, 1  ;;  %v552_v41 = vld [vmem:[#allocation2 + $0x30] sm:$0xff]  ;;  %v585_v44 = vsel %vm582_vm2, %v583_v34, %v584_v28  ;;  %v587_v45 = vsel %vm582_vm2, %v584_v28, %v586_v35  ;;  %v811_v48 = vld [vmem:[#allocation2 + $0x20] sm:$0x3]  ;;  %v819_v49 = vrot.slane %v810_v42, 2  ;;  %v3304_v11 = vld [vmem:[#allocation9 + $0x78] sm:$0xff]  }
  0x7e   : > { %3014 = vmatprep.subr.bf16.mxu1 %v3290_v13  ;;  %3020 = vmatprep.mubr.bf16.mxu1 %v554_v36  ;;  %v555_v46 = vpack.c.bf16 %v3809_v25, %v552_v41  ;;  %v812_v50 = vld [vmem:[#allocation2 + $0x30] sm:$0xfc]  ;;  %v597_v51 = vpack.c.bf16 %v587_v45, %v585_v44  ;;  %v590_v52 = vsel %vm582_vm2, %v588_v39, %v589_v29  ;;  %v822_v55 = vrot.slane %v811_v48, 2  ;;  %v813_v56 = vld [vmem:[#allocation2 + $0x50] sm:$0x3]  ;;  %v3317_v24 = vld [vmem:[#allocation9] sm:$0xff]  }
  0x7f   : > { %v592_v53 = vsel %vm582_vm2, %v589_v29, %v591_v40  ;;  %v821_v58 = vsel %vm818_vm3, %v819_v49, %v820_v33  ;;  %v824_v59 = vrot.slane %v812_v50, 2  ;;  %v827_v60 = vrot.slane %v813_v56, 2  ;;  %v3318_v25 = vld [vmem:[#allocation9 + $0x40] sm:$0xff]  }
  0x80   : > { %2995 = vmatpush3.bf16.msra.mxu0 %v3289_v12  ;;  %v598_v57 = vpack.c.bf16 %v592_v53, %v590_v52  ;;  %3000 = vmatprep.mubr.bf16.mxu0 %v597_v51  ;;  %v823_v61 = vsel %vm818_vm3, %v820_v33, %v822_v55  ;;  %v3305_v12 = vld [vmem:[#allocation9 + $0x30] sm:$0xff]   ;;  %v2675_v36 = vld [vmem:[%s4184_s2] ss:$0 sm:$0xff] }
  0x81   : > { %3015 = vmatpush3.bf16.msra.mxu1 %v3290_v13  ;;  %2996 = vmatprep.subr.bf16.mxu0 %v3291_v22  ;;  %v833_v62 = vpack.c.bf16 %v823_v61, %v821_v58  ;;  %v826_v7 = vsel %vm818_vm3, %v824_v59, %v825_v43  ;;  %v828_v8 = vsel %vm818_vm3, %v825_v43, %v827_v60  ;;  %v3307_v13 = vld [vmem:[#allocation9 + $0x28] sm:$0xff]  }
  0x82   : > { %3016 = vmatprep.subr.bf16.mxu1 %v3292_v23  ;;  %v834_v9 = vpack.c.bf16 %v828_v8, %v826_v7 }
  0x84   : > { %2997 = vmatpush3.bf16.msra.mxu0 %v3291_v22  ;;  %v3314_v22 = vld [vmem:[#allocation9 + $0x50] sm:$0xff]  }
  0x85   : > { %3017 = vmatpush3.bf16.msra.mxu1 %v3292_v23  ;;  %2998 = vmatprep.subr.bf16.mxu0 %v3293_v26  ;;  %v3316_v23 = vld [vmem:[#allocation9 + $0x48] sm:$0xff]  }
  0x86   : > { %3018 = vmatprep.subr.bf16.mxu1 %v3294_v27 }
  0x88   : > { %2999 = vmatpush3.bf16.msra.mxu0 %v3293_v26  ;;  %v3823_v26 = vld [vmem:[#allocation9 + $0xb8] sm:$0xff]  }
  0x89   : > { %3019 = vmatpush3.bf16.msra.mxu1 %v3294_v27  ;;  %3024 = vmatprep.subr.bf16.mxu0 %v3295_v47 }
  0x8a   : > { %3044 = vmatprep.subr.bf16.mxu1 %v3304_v11 }
  0x8b   : > { %3001 = vmatmul.mubr.bf16.vlgmr.msra.gmra.mxu0 %v598_v57 }
  0x8c   : > { %3021 = vmatmul.mubr.bf16.vlgmr.msra.gmra.mxu1 %v555_v46  ;;  %3025 = vmatpush3.bf16.msra.mxu0 %v3295_v47 }
  0x8d   : > { %3026 = vmatprep.subr.bf16.mxu0 %v3296_v54  ;;  %3040 = vmatprep.mubr.bf16.mxu0 %v833_v62 }
  0x8e   : > { %3045 = vmatpush3.bf16.msra.mxu1 %v3304_v11 }
  0x8f   : > { %3046 = vmatprep.subr.bf16.mxu1 %v3306_v14 }
  0x90   : > { %3027 = vmatpush3.bf16.msra.mxu0 %v3296_v54 }
  0x91   : > { %3028 = vmatprep.subr.bf16.mxu0 %v3297_v63 }
  0x92   : > { %3047 = vmatpush3.bf16.msra.mxu1 %v3306_v14 }
  0x93   : > { %3048 = vmatprep.subr.bf16.mxu1 %v3308_v16 }
  0x94   : > { %3029 = vmatpush3.bf16.msra.mxu0 %v3297_v63 }
  0x95   : > { %3030 = vmatprep.subr.bf16.mxu0 %v3298_v2 }
  0x96   : > { %3049 = vmatpush3.bf16.msra.mxu1 %v3308_v16 }
  0x97   : > { %3050 = vmatprep.subr.bf16.mxu1 %v3310_v18 }
  0x98   : > { %3031 = vmatpush3.bf16.msra.mxu0 %v3298_v2 }
  0x99   : > { %3032 = vmatprep.subr.bf16.mxu0 %v3299_v3 }
  0x9a   : > { %3051 = vmatpush3.bf16.msra.mxu1 %v3310_v18 }
  0x9b   : > { %3052 = vmatprep.subr.bf16.mxu1 %v3312_v20 }
  0x9c   : > { %3033 = vmatpush3.bf16.msra.mxu0 %v3299_v3 }
  0x9d   : > { %3034 = vmatprep.subr.bf16.mxu0 %v3300_v4 }
  0x9e   : > { %3053 = vmatpush3.bf16.msra.mxu1 %v3312_v20 }
  0x9f   : > { %3054 = vmatprep.subr.bf16.mxu1 %v3314_v22 }
  0xa0   : > { %3035 = vmatpush3.bf16.msra.mxu0 %v3300_v4 }
  0xa1   : > { %3036 = vmatprep.subr.bf16.mxu0 %v3301_v5 }
  0xa2   : > { %3055 = vmatpush3.bf16.msra.mxu1 %v3314_v22 }
  0xa3   : > { %3056 = vmatprep.subr.bf16.mxu1 %v3316_v23 }
  0xa4   : > { %3037 = vmatpush3.bf16.msra.mxu0 %v3301_v5 }
  0xa5   : > { %3038 = vmatprep.subr.bf16.mxu0 %v3302_v6 }
  0xa6   : > { %3057 = vmatpush3.bf16.msra.mxu1 %v3316_v23 }
  0xa7   : > { %3058 = vmatprep.subr.bf16.mxu1 %v3318_v25 }
  0xa8   : > { %3039 = vmatpush3.bf16.msra.mxu0 %v3302_v6 }
  0xa9   : > { %3064 = vmatprep.subr.bf16.mxu0 %v3303_v10 }
  0xaa   : > { %3059 = vmatpush3.bf16.msra.mxu1 %v3318_v25 }
  0xab   : > { %3041 = vmatmul.mubr.bf16.vlgmr.msra.gmra.mxu0 %v834_v9  ;;  %3084 = vmatprep.subr.bf16.mxu1 %v3823_v26 }
  0xac   : > { %3065 = vmatpush3.bf16.msra.mxu0 %v3303_v10 }
  0xad   : > { %3066 = vmatprep.subr.bf16.mxu0 %v3305_v12 }
  0xb0   : > { %3067 = vmatpush3.bf16.msra.mxu0 %v3305_v12 }
  0xb1   : > { %3068 = vmatprep.subr.bf16.mxu0 %v3307_v13 }
  0xb4   : > { %3069 = vmatpush3.bf16.msra.mxu0 %v3307_v13 }
  0xb5   : > { %3070 = vmatprep.subr.bf16.mxu0 %v3309_v15 }
  0xb8   : > { %3071 = vmatpush3.bf16.msra.mxu0 %v3309_v15 }
  0xb9   : > { %3072 = vmatprep.subr.bf16.mxu0 %v3311_v17 }
  0xbc   : > { %3073 = vmatpush3.bf16.msra.mxu0 %v3311_v17 }
  0xbd   : > { %3074 = vmatprep.subr.bf16.mxu0 %v3313_v19 }
  0xc0   : > { %3075 = vmatpush3.bf16.msra.mxu0 %v3313_v19 }
  0xc1   : > { %3076 = vmatprep.subr.bf16.mxu0 %v3315_v21 }
  0xc4   : > { %3077 = vmatpush3.bf16.msra.mxu0 %v3315_v21 }
  0xc5   : > { %3078 = vmatprep.subr.bf16.mxu0 %v3317_v24 }
  0xc8   : > { %3079 = vmatpush3.bf16.msra.mxu0 %v3317_v24 }
  0xc9   : > { %3104 = vmatprep.subr.mxu0 %v3551_v1 }
 0x14b   : > { %v3002_v27 = vpop.f32.mrf.mxu0 }
 0x14c   : > { %v3022_v28 = vpop.f32.mrf.mxu1 }
 0x14d   : > { %v698_v29 = vpop.f32.mrf.mxu0  ;;  %v804_v34 = vadd.f32 %v3022_v28, %v3002_v27  ;;  %v3320_v28 = vld [vmem:[#allocation9 + $0xb0] sm:$0xff]  }
 0x14e   : > { %v795_v30 = vpop.f32.mrf.mxu1 }
 0x14f   : > { %v3003_v31 = vpop.f32.mrf.mxu0  ;;  %v796_v37 = vadd.f32 %v795_v30, %v698_v29  ;;  %v3321_v30 = vld [vmem:[#allocation9 + $0xa8] sm:$0xff]  }
 0x150   : > { %v3023_v32 = vpop.f32.mrf.mxu1 }
 0x151   : > { %v701_v33 = vpop.f32.mrf.mxu0  ;;  %v807_v41 = vadd.f32 %v3023_v32, %v3003_v31  ;;  %v3322_v31 = vld [vmem:[#allocation9 + $0xa0] sm:$0xff]   ;;  %v3323_v32 = vld [vmem:[#allocation9 + $0x98] sm:$0xff]  }
 0x152   : > { %v798_v39 = vpop.f32.mrf.mxu1 }
 0x153   : > { %v799_v45 = vadd.f32 %v798_v39, %v701_v33  ;;  %v3324_v33 = vld [vmem:[#allocation9 + $0x90] sm:$0xff]  }
 0x16b   : > { %v3042_v35 = vpop.f32.mrf.mxu0 }
 0x16c   : > { %v951_v38 = vadd.f32 %v3042_v35, %v804_v34  ;;  %v3325_v34 = vld [vmem:[#allocation9 + $0x88] sm:$0xff]  }
 0x16d   : > { %v934_v40 = vpop.f32.mrf.mxu0 }
 0x16e   : > { %v962_v42 = vadd.f32 %v2675_v36, %v951_v38  ;;  %v949_v43 = vadd.f32 %v934_v40, %v796_v37 }
 0x16f   : > { %v3043_v44 = vpop.f32.mrf.mxu0 }
 0x170   : > { %v966_v46 = vmax.f32 %v962_v42, 0.0  ;;  %v960_v47 = vadd.f32 %v2675_v36, %v949_v43  ;;  %v952_v48 = vadd.f32 %v3043_v44, %v807_v41  ;;  %v1431_v43 = vld [vmem:[%s4187_s5 + $0x78] sm:$0xff]  ;;  %v1430_v44 = vld [vmem:[%s4187_s5 + $0x70] sm:$0xff] }
 0x171   : > { %v937_v49 = vpop.f32.mrf.mxu0 }
 0x172   : > { %v975_v50 = vrot.slane %v966_v46, 7  ;;  %v964_v51 = vmax.f32 %v960_v47, 0.0  ;;  %v963_v52 = vadd.f32 %v2675_v36, %v952_v48  ;;  %v950_v53 = vadd.f32 %v937_v49, %v799_v45  ;;  %v1429_v45 = vld [vmem:[%s4187_s5 + $0x68] sm:$0xff]  ;;  %v1428_v46 = vld [vmem:[%s4187_s5 + $0x60] sm:$0xff]  ;;  %v1427_v47 = vld [vmem:[%s4187_s5 + $0x58] sm:$0xff] }
 0x173   : > { %v1426_v48 = vld [vmem:[%s4187_s5 + $0x50] sm:$0xff]  ;;  %v1425_v49 = vld [vmem:[%s4187_s5 + $0x48] sm:$0xff] }
 0x174   : > { %987 = vst [vmem:[#allocation2 + $0x30] sm:$0xfe] %v975_v50  ;;  %v972_v54 = vrot.slane %v964_v51, 7  ;;  %v967_v55 = vmax.f32 %v963_v52, 0.0  ;;  %v961_v56 = vadd.f32 %v2675_v36, %v950_v53  ;;  %v3326_v36 = vld [vmem:[#allocation9 + $0x80] sm:$0xff]   ;;  %v1423_v51 = vld [vmem:[%s4187_s5 + $0x38] sm:$0xff] }
 0x175   : > { %v1422_v52 = vld [vmem:[%s4187_s5 + $0x30] sm:$0xff]  ;;  %v1421_v53 = vld [vmem:[%s4187_s5 + $0x28] sm:$0xff] }
 0x176   : > { %984 = vst [vmem:[#allocation2] sm:$0xfe] %v972_v54  ;;  %v976_v57 = vrot.slane %v967_v55, 7  ;;  %v965_v58 = vmax.f32 %v961_v56, 0.0  ;;  %v1419_v55 = vld [vmem:[%s4187_s5 + $0x18] sm:$0xff]  ;;  %v1418_v56 = vld [vmem:[%s4187_s5 + $0x10] sm:$0xff] }
 0x178   : > { %989 = vst [vmem:[#allocation2 + $0x50] sm:$0x1] %v976_v57  ;;  %v973_v59 = vrot.slane %v965_v58, 7  ;;  %v3830_v61 = vsel %vm531_vm1, %v975_v50, %v976_v57  ;;  %v1424_v50 = vld [vmem:[%s4187_s5 + $0x40] sm:$0xff]  ;;  %v1417_v57 = vld [vmem:[%s4187_s5 + $0x8] sm:$0xff] }
 0x179   : > { %v1028_v9 = vrot.slane %v3830_v61, 1  ;;  %v1263_v39 = vrot.slane %v3830_v61, 2  ;;  %v1416_v58 = vld [vmem:[%s4187_s5] sm:$0xff] }
 0x17a   : > { %986 = vst [vmem:[#allocation2 + $0x20] sm:$0x1] %v973_v59  ;;  %v974_v62 = vsel %vm531_vm1, %v972_v54, %v973_v59  ;;  %v1420_v54 = vld [vmem:[%s4187_s5 + $0x20] sm:$0xff] }
 0x17b   : > { %v992_v60 = vld [vmem:[#allocation2 + $0x30] sm:$0xff]  ;;  %v1023_v12 = vrot.slane %v974_v62, 1  ;;  %v1258_v17 = vrot.slane %v974_v62, 2 }
 0x17c   : > { %v1014_v4 = vld [vmem:[#allocation2 + $0x30] sm:$0xfe]  ;;  %v995_v5 = vpack.c.bf16 %v3830_v61, %v992_v60 }
 0x17d   : > { %v990_v63 = vld [vmem:[#allocation2] sm:$0xff]  ;;  %v1027_v13 = vrot.slane %v1014_v4, 1 }
 0x17e   : > { %v1012_v2 = vld [vmem:[#allocation2] sm:$0xfe]  ;;  %v994_v3 = vpack.c.bf16 %v974_v62, %v990_v63 }
 0x17f   : > { %v1015_v6 = vld [vmem:[#allocation2 + $0x50] sm:$0x1]  ;;  %v1249_v7 = vld [vmem:[#allocation2] sm:$0xfc]  ;;  %v1022_v8 = vrot.slane %v1012_v2, 1  ;;  %v1029_v24 = vsel %vm582_vm2, %v1027_v13, %v1028_v9 }
 0x180   : > { %3080 = vmatprep.mubr.bf16.mxu0 %v994_v3  ;;  %v1030_v10 = vrot.slane %v1015_v6, 1  ;;  %v1257_v16 = vrot.slane %v1249_v7, 2  ;;  %v1252_v35 = vld [vmem:[#allocation2 + $0x50] sm:$0x3]  ;;  %v2700_v6 = vld [vmem:[%s4186_s4] ss:$0 sm:$0xff] }
 0x181   : > { %3081 = vmatmul.mubr.bf16.vlgmr.msra.gmra.mxu0 %v995_v5  ;;  %v1013_v11 = vld [vmem:[#allocation2 + $0x20] sm:$0x1]  ;;  %v1024_v20 = vsel %vm582_vm2, %v1022_v8, %v1023_v12  ;;  %v1265_v37 = vrot.slane %v1252_v35, 2 }
 0x182   : > { %v1250_v14 = vld [vmem:[#allocation2 + $0x20] sm:$0x3]  ;;  %v1025_v15 = vrot.slane %v1013_v11, 1  ;;  %v1031_v19 = vsel %vm582_vm2, %v1028_v9, %v1030_v10  ;;  %v1259_v27 = vsel %vm818_vm3, %v1257_v16, %v1258_v17  ;;  %3105 = vmatpush3.msra.mxu0 %v1431_v43  ;;  %3136 = vmatprep.mubr.msk.f32.mxu0 %vm3552_vm4, %v3551_v1 }
 0x183   : > { %v1260_v18 = vrot.slane %v1250_v14, 2  ;;  %v1037_v25 = vpack.c.bf16 %v1031_v19, %v1029_v24  ;;  %v1266_v40 = vsel %vm818_vm3, %v1263_v39, %v1265_v37  ;;  %3106 = vmatprep.subr.mxu0 %v3551_v1  ;;  %v1515_v43 = vld [vmem:[%s4189_s7] sm:$0x3] }
 0x184   : > { %v1026_v21 = vsel %vm582_vm2, %v1023_v12, %v1025_v15  ;;  %3107 = vmatpush3.msra.mxu0 %v1430_v44 }
 0x185   : > { %v1261_v22 = vsel %vm818_vm3, %v1258_v17, %v1260_v18  ;;  %v1036_v23 = vpack.c.bf16 %v1026_v21, %v1024_v20  ;;  %3108 = vmatprep.subr.mxu0 %v3551_v1 }
 0x186   : > { %v1271_v29 = vpack.c.bf16 %v1261_v22, %v1259_v27  ;;  %3109 = vmatpush3.msra.mxu0 %v1429_v45 }
 0x187   : > { %3060 = vmatprep.mubr.bf16.mxu1 %v1036_v23  ;;  %3110 = vmatprep.subr.mxu0 %v3551_v1 }
 0x188   : > { %3061 = vmatmul.mubr.bf16.vlgmr.msra.gmra.mxu1 %v1037_v25  ;;  %3111 = vmatpush3.msra.mxu0 %v1428_v46 }
 0x189   : > { %3085 = vmatpush3.bf16.msra.mxu1 %v3823_v26  ;;  %3100 = vmatprep.mubr.bf16.mxu1 %v1271_v29  ;;  %v1251_v26 = vld [vmem:[#allocation2 + $0x30] sm:$0xfc] }
 0x18a   : > { %3086 = vmatprep.subr.bf16.mxu1 %v3320_v28  ;;  %v1262_v38 = vrot.slane %v1251_v26, 2  ;;  %3112 = vmatprep.subr.mxu0 %v3551_v1 }
 0x18b   : > { %3113 = vmatpush3.msra.mxu0 %v1427_v47 }
 0x18c   : > { %v1264_v41 = vsel %vm818_vm3, %v1262_v38, %v1263_v39  ;;  %3114 = vmatprep.subr.mxu0 %v3551_v1 }
 0x18d   : > { %3087 = vmatpush3.bf16.msra.mxu1 %v3320_v28  ;;  %v1272_v42 = vpack.c.bf16 %v1266_v40, %v1264_v41  ;;  %3115 = vmatpush3.msra.mxu0 %v1426_v48 }
 0x18e   : > { %3088 = vmatprep.subr.bf16.mxu1 %v3321_v30  ;;  %3116 = vmatprep.subr.mxu0 %v3551_v1 }
 0x18f   : > { %3117 = vmatpush3.msra.mxu0 %v1425_v49 }
 0x190   : > { %3118 = vmatprep.subr.mxu0 %v3551_v1 }
 0x191   : > { %3089 = vmatpush3.bf16.msra.mxu1 %v3321_v30  ;;  %3119 = vmatpush3.msra.mxu0 %v1424_v50  ;;  %v1645_v50 = vand.u32 127, %v508_v0 }
 0x192   : > { %3090 = vmatprep.subr.bf16.mxu1 %v3322_v31  ;;  %3120 = vmatprep.subr.mxu0 %v3551_v1 }
 0x193   : > { %3121 = vmatpush3.msra.mxu0 %v1423_v51 }
 0x194   : > { %3122 = vmatprep.subr.mxu0 %v3551_v1 }
 0x195   : > { %3091 = vmatpush3.bf16.msra.mxu1 %v3322_v31  ;;  %3123 = vmatpush3.msra.mxu0 %v1422_v52 }
 0x196   : > { %3092 = vmatprep.subr.bf16.mxu1 %v3323_v32  ;;  %3124 = vmatprep.subr.mxu0 %v3551_v1 }
 0x197   : > { %3125 = vmatpush3.msra.mxu0 %v1421_v53 }
 0x198   : > { %3126 = vmatprep.subr.mxu0 %v3551_v1 }
 0x199   : > { %3093 = vmatpush3.bf16.msra.mxu1 %v3323_v32  ;;  %3127 = vmatpush3.msra.mxu0 %v1420_v54 }
 0x19a   : > { %3094 = vmatprep.subr.bf16.mxu1 %v3324_v33  ;;  %3128 = vmatprep.subr.mxu0 %v3551_v1 }
 0x19b   : > { %3129 = vmatpush3.msra.mxu0 %v1419_v55 }
 0x19c   : > { %3130 = vmatprep.subr.mxu0 %v3551_v1 }
 0x19d   : > { %3095 = vmatpush3.bf16.msra.mxu1 %v3324_v33  ;;  %3131 = vmatpush3.msra.mxu0 %v1418_v56 }
 0x19e   : > { %3096 = vmatprep.subr.bf16.mxu1 %v3325_v34  ;;  %3132 = vmatprep.subr.mxu0 %v3551_v1 }
 0x19f   : > { %3133 = vmatpush3.msra.mxu0 %v1417_v57 }
 0x1a0   : > { %3134 = vmatprep.subr.mxu0 %v3551_v1 }
 0x1a1   : > { %3097 = vmatpush3.bf16.msra.mxu1 %v3325_v34  ;;  %3135 = vmatpush3.msra.mxu0 %v1416_v58 }
 0x1a2   : > { %3098 = vmatprep.subr.bf16.mxu1 %v3326_v36  ;;  %3139 = vmatprep.subr.mxu0 %v3551_v1 }
 0x1a5   : > { %3099 = vmatpush3.bf16.msra.mxu1 %v3326_v36 }
 0x1a8   : > { %3101 = vmatmul.mubr.bf16.vlgmr.msra.gmra.mxu1 %v1272_v42 }
 0x241   : > { %v3082_v61 = vpop.f32.mrf.mxu0 }
 0x243   : > { %v1234_v63 = vpop.f32.mrf.mxu0 }
 0x245   : > { %v3083_v4 = vpop.f32.mrf.mxu0 }
 0x247   : > { %v1237_v13 = vpop.f32.mrf.mxu0 }
 0x248   : > { %v3062_v59 = vpop.f32.mrf.mxu1 }
 0x249   : > { %v1243_v3 = vadd.f32 %v3082_v61, %v3062_v59  ;;  %v1893_v61 = vld [vmem:[#allocation10 + $0x1f8] sm:$0xff] }
 0x24a   : > { %v1137_v60 = vpop.f32.mrf.mxu1  ;;  %2832 = vmatprep.subr.mxu1 %v1893_v61  ;;  %v1787_v61 = vld [vmem:[#allocation10 + $0x30] sm:$0xff] }
 0x24b   : > { %v1235_v7 = vadd.f32 %v1234_v63, %v1137_v60  ;;  %v1812_v60 = vld [vmem:[#allocation10 + $0xf8] sm:$0xff]  ;;  %v1892_v63 = vld [vmem:[#allocation10 + $0x1f0] sm:$0xff] }
 0x24c   : > { %v3063_v62 = vpop.f32.mrf.mxu1 }
 0x24d   : > { %v1246_v10 = vadd.f32 %v3083_v4, %v3063_v62  ;;  %v1877_v62 = vld [vmem:[#allocation10 + $0x178] sm:$0xff]  ;;  %v1875_v4 = vld [vmem:[#allocation10 + $0x168] sm:$0xff] }
 0x24e   : > { %v1140_v2 = vpop.f32.mrf.mxu1  ;;  %2833 = vmatpush3.msra.mxu1 %v1877_v62  ;;  %v1881_v62 = vld [vmem:[#allocation10 + $0x198] sm:$0xff] }
 0x24f   : > { %v1238_v15 = vadd.f32 %v1237_v13, %v1140_v2  ;;  %v1876_v2 = vld [vmem:[#allocation10 + $0x170] sm:$0xff]  ;;  %2834 = vmatprep.subr.mxu1 %v1892_v63  ;;  %v1802_v63 = vld [vmem:[#allocation10 + $0xa8] sm:$0xff] }
 0x250   : > { %2835 = vmatpush3.msra.mxu1 %v1876_v2  ;;  %v1811_v13 = vld [vmem:[#allocation10 + $0xf0] sm:$0xff]  ;;  %v1865_v2 = vld [vmem:[#allocation10 + $0x118] sm:$0xff] }
 0x268   : > { %v3102_v5 = vpop.f32.mrf.mxu1 }
 0x269   : > { %v1389_v8 = vadd.f32 %v3102_v5, %v1243_v3  ;;  %v1891_v3 = vld [vmem:[#allocation10 + $0x1e8] sm:$0xff]  ;;  %v1890_v5 = vld [vmem:[#allocation10 + $0x1e0] sm:$0xff] }
 0x26a   : > { %v1372_v9 = vpop.f32.mrf.mxu1  ;;  %2836 = vmatprep.subr.mxu1 %v1891_v3  ;;  %v1786_v3 = vld [vmem:[#allocation10 + $0x28] sm:$0xff] }
 0x26b   : > { %v3914_v11 = vadd.f32 %v2700_v6, %v1389_v8  ;;  %v1387_v12 = vadd.f32 %v1372_v9, %v1235_v7  ;;  %2837 = vmatpush3.msra.mxu1 %v1875_v4  ;;  %v1880_v4 = vld [vmem:[#allocation10 + $0x190] sm:$0xff] }
 0x26c   : > { %v3103_v14 = vpop.f32.mrf.mxu1  ;;  %2838 = vmatprep.subr.mxu1 %v1890_v5 }
 0x26d   : > { %v1736_v16 = vrot.slane %v3914_v11, 7  ;;  %v3917_v17 = vadd.f32 %v2700_v6, %v1387_v12  ;;  %v1390_v18 = vadd.f32 %v3103_v14, %v1246_v10  ;;  %v1796_v12 = vld [vmem:[#allocation10 + $0x78] sm:$0xff]  ;;  %v1874_v14 = vld [vmem:[#allocation10 + $0x160] sm:$0xff] }
 0x26e   : > { %v1375_v19 = vpop.f32.mrf.mxu1  ;;  %2839 = vmatpush3.msra.mxu1 %v1874_v14  ;;  %v1878_v14 = vld [vmem:[#allocation10 + $0x180] sm:$0xff] }
 0x26f   : > { %1748 = vst [vmem:[#allocation2 + $0x30] sm:$0xfe] %v1736_v16  ;;  %v1733_v20 = vrot.slane %v3917_v17, 7  ;;  %v3920_v21 = vadd.f32 %v2700_v6, %v1390_v18  ;;  %v1388_v22 = vadd.f32 %v1375_v19, %v1238_v15  ;;  %1685 = vrot.lane.b32.xlu1 %v3917_v17, %s3553_s3  ;;  %1649 = vrot.lane.b32.xlu0 %v3917_v17, %s3554_s15  ;;  %v1795_v15 = vld [vmem:[#allocation10 + $0x70] sm:$0xff]  ;;  %v1810_v18 = vld [vmem:[#allocation10 + $0xe8] sm:$0xff]  ;;  %v1873_v19 = vld [vmem:[#allocation10 + $0x158] sm:$0xff] }
 0x271   : > { %1745 = vst [vmem:[#allocation2] sm:$0xfe] %v1733_v20  ;;  %v1737_v23 = vrot.slane %v3920_v21, 7  ;;  %v3926_v24 = vadd.f32 %v2700_v6, %v1388_v22  ;;  %v1409_v25 = vadd.f32 %v3920_v21, %v3914_v11  ;;  %v2701_v6 = vld [vmem:[%s4188_s6] ss:$0 sm:$0xff]  ;;  %v1888_v22 = vld [vmem:[#allocation10 + $0x1d0] sm:$0xff] }
 0x273   : > { %v3931_v27 = vsel %vm531_vm1, %v1736_v16, %v1737_v23  ;;  %1750 = vst [vmem:[#allocation2 + $0x50] sm:$0x1] %v1737_v23  ;;  %v1734_v28 = vrot.slane %v3926_v24, 7  ;;  %1687 = vrot.lane.b32.xlu1 %v3926_v24, %s3553_s3  ;;  %1651 = vrot.lane.b32.xlu0 %v3926_v24, %s3554_s15  ;;  %v1402_v29 = vadd.f32 %v3926_v24, %v3917_v17  ;;  %v1410_v30 = vrot.slane %v1409_v25, 4  ;;  %v1889_v16 = vld [vmem:[#allocation10 + $0x1d8] sm:$0xff]  ;;  %v1809_v23 = vld [vmem:[#allocation10 + $0xe0] sm:$0xff] }
 0x274   : > { %2840 = vmatprep.subr.mxu1 %v1889_v16  ;;  %v1784_v16 = vld [vmem:[#allocation10 + $0x18] sm:$0xff] }
 0x275   : > { %1747 = vst [vmem:[#allocation2 + $0x20] sm:$0x1] %v1734_v28  ;;  %v1403_v31 = vrot.slane %v1402_v29, 4  ;;  %v1411_v32 = vadd.f32 %v1410_v30, %v1409_v25  ;;  %v3940_v33 = vsel %vm531_vm1, %v1733_v20, %v1734_v28  ;;  %v1794_v20 = vld [vmem:[#allocation10 + $0x68] sm:$0xff]  ;;  %2841 = vmatpush3.msra.mxu1 %v1873_v19  ;;  %v1872_v25 = vld [vmem:[#allocation10 + $0x150] sm:$0xff]  ;;  %v1793_v28 = vld [vmem:[#allocation10 + $0x60] sm:$0xff] }
 0x276   : > { %2842 = vmatprep.subr.mxu1 %v1888_v22  ;;  %v1808_v30 = vld [vmem:[#allocation10 + $0xd8] sm:$0xff]  ;;  %v1799_v19 = vld [vmem:[#allocation10 + $0x90] sm:$0xff]  ;;  %v3559_v22 = vmov 0  }
 0x277   : > { %1655 = vrot.lane.b32.xlu1 %v3920_v21, %s3554_s15  ;;  %1653 = vrot.lane.b32.xlu0 %v3914_v11, %s3554_s15  ;;  %v1404_v34 = vadd.f32 %v1403_v31, %v1402_v29  ;;  %v1412_v35 = vrot.slane %v1411_v32, 2  ;;  %v1887_v29 = vld [vmem:[#allocation10 + $0x1c8] sm:$0xff] }
 0x278   : > { %2843 = vmatpush3.msra.mxu1 %v1872_v25  ;;  %v1871_v31 = vld [vmem:[#allocation10 + $0x148] sm:$0xff]  ;;  %v1783_v25 = vld [vmem:[#allocation10 + $0x10] sm:$0xff] }
 0x279   : > { %v1405_v36 = vrot.slane %v1404_v34, 2  ;;  %v1413_v26 = vadd.f32 %v1412_v35, %v1411_v32  ;;  %2844 = vmatprep.subr.mxu1 %v1887_v29  ;;  %v1792_v32 = vld [vmem:[#allocation10 + $0x58] sm:$0xff]  ;;  %v1807_v35 = vld [vmem:[#allocation10 + $0xd0] sm:$0xff]  ;;  %v1798_v29 = vld [vmem:[#allocation10 + $0x88] sm:$0xff] }
 0x27a   : > { %2845 = vmatpush3.msra.mxu1 %v1871_v31 }
 0x27b   : > { %1691 = vrot.lane.b32.xlu1 %v3920_v21, %s3553_s3  ;;  %1689 = vrot.lane.b32.xlu0 %v3914_v11, %s3553_s3  ;;  %v1406_v37 = vadd.f32 %v1405_v36, %v1404_v34  ;;  %v1414_v38 = vrot.slane %v1413_v26, 1  ;;  %v1886_v34 = vld [vmem:[#allocation10 + $0x1c0] sm:$0xff]  ;;  %s504_s3 = scalar_lea.vmem [#allocation12], %s2646_s29 }
 0x27c   : > { %2846 = vmatprep.subr.mxu1 %v1886_v34  ;;  %v1870_v36 = vld [vmem:[#allocation10 + $0x140] sm:$0xff]  ;;  %v1782_v34 = vld [vmem:[#allocation10 + $0x8] sm:$0xff] }
 0x27d   : > { %v1407_v39 = vrot.slane %v1406_v37, 1  ;;  %v1415_v41 = vadd.f32 %v1414_v38, %v1413_v26  ;;  %v1791_v26 = vld [vmem:[#allocation10 + $0x50] sm:$0xff]  ;;  %2847 = vmatpush3.msra.mxu1 %v1870_v36  ;;  %v1806_v38 = vld [vmem:[#allocation10 + $0xc8] sm:$0xff]  ;;  %v1781_v36 = vld [vmem:[#allocation10] sm:$0xff] }
 0x27f   : > { %v1408_v40 = vadd.f32 %v1407_v39, %v1406_v37  ;;  %v1885_v37 = vld [vmem:[#allocation10 + $0x1b8] sm:$0xff] }
 0x280   : > { %2848 = vmatprep.subr.mxu1 %v1885_v37  ;;  %v1869_v39 = vld [vmem:[#allocation10 + $0x138] sm:$0xff] }
 0x281   : > { %v1442_v42 = vsel %vm1441_vm5, %v1415_v41, %v1408_v40  ;;  %v1790_v40 = vld [vmem:[#allocation10 + $0x48] sm:$0xff]  ;;  %2849 = vmatpush3.msra.mxu1 %v1869_v39  ;;  %v1884_v41 = vld [vmem:[#allocation10 + $0x1b0] sm:$0xff] }
 0x282   : > { %3137 = vmatmul.mubr.f32.vlgmr.msra.gmra.mxu0 %v1442_v42  ;;  %v1805_v42 = vld [vmem:[#allocation10 + $0xc0] sm:$0xff]  ;;  %2850 = vmatprep.subr.mxu1 %v1884_v41 }
 0x283   : > { %3141 = vmatprep.mubr.msk.f32.mxu0 %vm3552_vm4, %v3551_v1  ;;  %3140 = vmatpush3.msk.msra.mxu0 %vm1527_vm6, %v1515_v43  ;;  %v1868_v43 = vld [vmem:[#allocation10 + $0x130] sm:$0xff] }
 0x284   : > { %2876 = vmatprep.subr.mxu0 %v1812_v60  ;;  %2851 = vmatpush3.msra.mxu1 %v1868_v43 }
 0x2e1   : > { %v1686_v44 = vpop.permute.xlu1 %1685  ;;  %v1650_v45 = vpop.permute.xlu0 %1649 }
 0x2e2   : > { %v3954_v46 = vmax.f32 %v3917_v17, %v1650_v45  ;;  %v3958_v49 = vmax.f32 %v3917_v17, %v1686_v44  ;;  %v1789_v44 = vld [vmem:[#allocation10 + $0x40] sm:$0xff]  ;;  %v1883_v45 = vld [vmem:[#allocation10 + $0x1a8] sm:$0xff] }
 0x2e3   : > { %2852 = vmatprep.subr.mxu1 %v1883_v45 }
 0x2e4   : > { %1661 = vrot.lane.b32.xlu0 %v3954_v46, %s3555_s23 }
 0x2e5   : > { %v1688_v47 = vpop.permute.xlu1 %1687  ;;  %v1652_v48 = vpop.permute.xlu0 %1651 }
 0x2e6   : > { %v3961_v1 = vmax.f32 %v3926_v24, %v1652_v48  ;;  %v3967_v53 = vmax.f32 %v3926_v24, %v1688_v47  ;;  %v1804_v47 = vld [vmem:[#allocation10 + $0xb8] sm:$0xff]  ;;  %v1867_v48 = vld [vmem:[#allocation10 + $0x128] sm:$0xff] }
 0x2e7   : > { %2853 = vmatpush3.msra.mxu1 %v1867_v48 }
 0x2e8   : > { %1697 = vrot.lane.b32.xlu0 %v3958_v49, %s3556_s26  ;;  %1663 = vrot.lane.b32.xlu1 %v3961_v1, %s3555_s23 }
 0x2e9   : > { %v1656_v51 = vpop.permute.xlu1 %1655  ;;  %v1654_v52 = vpop.permute.xlu0 %1653 }
 0x2ea   : > { %v3972_v54 = vmax.f32 %v3920_v21, %v1656_v51  ;;  %v3975_v55 = vmax.f32 %v3914_v11, %v1654_v52  ;;  %v1882_v51 = vld [vmem:[#allocation10 + $0x1a0] sm:$0xff] }
 0x2eb   : > { %2854 = vmatprep.subr.mxu1 %v1882_v51 }
 0x2ec   : > { %1646 = vrot.lane.b32.xlu0 %v1645_v50, %s3554_s15  ;;  %1699 = vrot.lane.b32.xlu1 %v3967_v53, %s3556_s26  ;;  %v1788_v50 = vld [vmem:[#allocation10 + $0x38] sm:$0xff]  ;;  %s2533_s15 = sshll.u32 %s504_s3, 4  ;;  %s4134_s15 = int_to_ptr.vmem [resolvable:$true] %s2533_s15 }
 0x2ed   : > { %v1692_v56 = vpop.permute.xlu1 %1691  ;;  %v1690_v57 = vpop.permute.xlu0 %1689  ;;  %s3469_s21 = scalar_lea.vmem %s4134_s15, 512 }
 0x2ee   : > { %v3980_v58 = vmax.f32 %v3920_v21, %v1692_v56  ;;  %v3983_v59 = vmax.f32 %v3914_v11, %v1690_v57  ;;  %v1803_v56 = vld [vmem:[#allocation10 + $0xb0] sm:$0xff]  ;;  %v1866_v57 = vld [vmem:[#allocation10 + $0x120] sm:$0xff]  ;;  %p3470_p4 = scmp.ne.s32.totalorder %s4134_s15, %s3469_s21 }
 0x2ef   : > { %2855 = vmatpush3.msra.mxu1 %v1866_v57  ;;  %v1813_v57 = vld [vmem:[#allocation2] sm:$0xfe] }
 0x2f0   : > { %1667 = vrot.lane.b32.xlu0 %v3972_v54, %s3555_s23  ;;  %1665 = vrot.lane.b32.xlu1 %v3975_v55, %s3555_s23  ;;  %s4139_s23 = scalar_lea.hbm %s4195_s13, %s2752_s17  ;;  %p3471_p12 = pnand %p3470_p4, %p4230_p6 }
 0x2f1   : > { %2856 = vmatprep.subr.mxu1 %v1881_v62 }
 0x2f2   : > { %2857 = vmatpush3.msra.mxu1 %v1865_v2  ;;  %p3472_p0 = pneg %p3471_p12 }
 0x2f3   : > { %2858 = vmatprep.subr.mxu1 %v1880_v4 }
 0x2f4   : > { %1703 = vrot.lane.b32.xlu0 %v3980_v58, %s3556_s26  ;;  %1701 = vrot.lane.b32.xlu1 %v3983_v59, %s3556_s26  ;;  %s2519_s26 = scalar_lea.sflag [#allocation6], %s3778_s25 }
 0x342   : > { %v1510_v7 = vpop.f32.mrf.mxu0 }
 0x343   : > { %v1511_v8 = vadd.f32 %v2701_v6, %v1510_v7 }
 0x344   : > { %v3138_v9 = vpop.f32.mrf.mxu0 }
 0x345   : > { %v1514_v10 = vmax.f32 %v1511_v8, 0.0  ;;  %v1801_v9 = vld [vmem:[#allocation10 + $0xa0] sm:$0xff] }
 0x347   : > { %3142 = vmatmul.mubr.msk.f32.vlgmr.msra.gmra.mxu0 %vm1523_vm7, %v1514_v10  ;;  %v1879_v10 = vld [vmem:[#allocation10 + $0x188] sm:$0xff] }
 0x348   : > { %2877 = vmatpush3.msra.mxu0 %v1796_v12  ;;  %v1785_v12 = vld [vmem:[#allocation10 + $0x20] sm:$0xff] }
 0x349   : > { %2878 = vmatprep.subr.mxu0 %v1811_v13  ;;  %v1863_v13 = vld [vmem:[#allocation10 + $0x108] sm:$0xff] }
 0x34a   : > { %2879 = vmatpush3.msra.mxu0 %v1795_v15 }
 0x34b   : > { %2880 = vmatprep.subr.mxu0 %v1810_v18 }
 0x34c   : > { %2881 = vmatpush3.msra.mxu0 %v1794_v20  ;;  %v1862_v20 = vld [vmem:[#allocation10 + $0x100] sm:$0xff] }
 0x34d   : > { %2882 = vmatprep.subr.mxu0 %v1809_v23 }
 0x34e   : > { %2883 = vmatpush3.msra.mxu0 %v1793_v28  ;;  %v2140_v28 = vld [vmem:[#allocation10 + $0x2f8] sm:$0xff] }
 0x34f   : > { %2884 = vmatprep.subr.mxu0 %v1808_v30 }
 0x350   : > { %2885 = vmatpush3.msra.mxu0 %v1792_v32 }
 0x351   : > { %2886 = vmatprep.subr.mxu0 %v1807_v35  ;;  %v1797_v35 = vld [vmem:[#allocation10 + $0x80] sm:$0xff] }
 0x352   : > { %2887 = vmatpush3.msra.mxu0 %v1791_v26 }
 0x353   : > { %2888 = vmatprep.subr.mxu0 %v1806_v38 }
 0x354   : > { %2889 = vmatpush3.msra.mxu0 %v1790_v40 }
 0x355   : > { %2890 = vmatprep.subr.mxu0 %v1805_v42 }
 0x356   : > { %v1662_v52 = vpop.permute.xlu0 %1661  ;;  %2891 = vmatpush3.msra.mxu0 %v1789_v44  ;;  %v2119_v44 = vld [vmem:[#allocation10 + $0x250] sm:$0xff] }
 0x357   : > { %v3991_v60 = vmax.f32 %v3954_v46, %v1662_v52  ;;  %2892 = vmatprep.subr.mxu0 %v1804_v47  ;;  %v1864_v46 = vld [vmem:[#allocation10 + $0x110] sm:$0xff] }
 0x358   : > { %2893 = vmatpush3.msra.mxu0 %v1788_v50  ;;  %2859 = vmatpush3.msra.mxu1 %v1864_v46 }
 0x359   : > { %1673 = vrot.lane.b32.xlu1 %v3991_v60, %s3557_s18  ;;  %2894 = vmatprep.subr.mxu0 %v1803_v56 }
 0x35a   : > { %v1664_v5 = vpop.permute.xlu1 %1663  ;;  %v1698_v6 = vpop.permute.xlu0 %1697  ;;  %2895 = vmatpush3.msra.mxu0 %v1787_v61  ;;  %2860 = vmatprep.subr.mxu1 %v1879_v10  ;;  %v1815_v10 = vld [vmem:[#allocation2 + $0x20] sm:$0x1] }
 0x35b   : > { %v3996_v7 = vmax.f32 %v3961_v1, %v1664_v5  ;;  %v3999_v8 = vmax.f32 %v3958_v49, %v1698_v6  ;;  %2896 = vmatprep.subr.mxu0 %v1802_v63  ;;  %v1800_v1 = vld [vmem:[#allocation10 + $0x98] sm:$0xff]  ;;  %2861 = vmatpush3.msra.mxu1 %v1863_v13  ;;  %v1833_v63 = vrot.slane %v1813_v57, 1  ;;  %v2133_v57 = vld [vmem:[#allocation10 + $0x2c0] sm:$0xff] }
 0x35c   : > { %2897 = vmatpush3.msra.mxu0 %v1786_v3  ;;  %2862 = vmatprep.subr.mxu1 %v1878_v14 }
 0x35d   : > { %1675 = vrot.lane.b32.xlu0 %v3996_v7, %s3557_s18  ;;  %1709 = vrot.lane.b32.xlu1 %v3999_v8, %s3558_s9 }
 0x35e   : > { %v1700_v15 = vpop.permute.xlu1 %1699  ;;  %v1647_v49 = vpop.permute.xlu0 %1646  ;;  %2898 = vmatprep.subr.mxu0 %v1801_v9  ;;  %2863 = vmatpush3.msra.mxu1 %v1862_v20  ;;  %v2139_v20 = vld [vmem:[#allocation10 + $0x2f0] sm:$0xff] }
 0x35f   : > { %v1706_v18 = vmax.f32 %v3967_v53, %v1700_v15  ;;  %vm1648_vm8 = vcmp.eq.s32.totalorder %v1647_v49, 1  ;;  %2899 = vmatpush3.msra.mxu0 %v1785_v12  ;;  %2920 = vmatprep.subr.mxu1 %v2140_v28  ;;  %v2123_v28 = vld [vmem:[#allocation10 + $0x270] sm:$0xff] }
 0x360   : > { %v1721_v23 = vsel %vm1648_vm8, 1, %v3559_v22  ;;  %2900 = vmatprep.subr.mxu0 %v1800_v1  ;;  %v1834_v1 = vrot.slane %v3940_v33, 1  ;;  %v1839_v22 = vrot.slane %v1815_v10, 1  ;;  %v2128_v10 = vld [vmem:[#allocation10 + $0x298] sm:$0xff] }
 0x361   : > { %1711 = vrot.lane.b32.xlu0 %v1706_v18, %s3558_s9  ;;  %3184 = vpush %v1721_v23  ;;  %2901 = vmatpush3.msra.mxu0 %v1784_v16  ;;  %v2124_v16 = vld [vmem:[#allocation10 + $0x278] sm:$0xff] }
 0x362   : > { %v1666_v30 = vpop.permute.xlu1 %1665  ;;  %v1668_v31 = vpop.permute.xlu0 %1667  ;;  %2902 = vmatprep.subr.mxu0 %v1799_v19 }
 0x363   : > { %v1671_v53 = vmax.f32 %v3975_v55, %v1666_v30  ;;  %v1672_v32 = vmax.f32 %v3972_v54, %v1668_v31  ;;  %2903 = vmatpush3.msra.mxu0 %v1783_v25  ;;  %v2122_v31 = vld [vmem:[#allocation10 + $0x268] sm:$0xff] }
 0x364   : > { %2904 = vmatprep.subr.mxu0 %v1798_v29  ;;  %v2138_v29 = vld [vmem:[#allocation10 + $0x2e8] sm:$0xff] }
 0x365   : > { %1677 = vrot.lane.b32.xlu1 %v1671_v53, %s3557_s18  ;;  %1679 = vrot.lane.b32.xlu0 %v1672_v32, %s3557_s18 }
 0x366   : > { %v1702_v26 = vpop.permute.xlu1 %1701  ;;  %v1704_v37 = vpop.permute.xlu0 %1703  ;;  %2905 = vmatpush3.msra.mxu0 %v1782_v34  ;;  %v2121_v34 = vld [vmem:[#allocation10 + $0x260] sm:$0xff] }
 0x367   : > { %v1707_v38 = vmax.f32 %v3983_v59, %v1702_v26  ;;  %v1708_v39 = vmax.f32 %v3980_v58, %v1704_v37  ;;  %2906 = vmatprep.subr.mxu0 %v1797_v35  ;;  %v1817_v35 = vld [vmem:[#allocation2 + $0x30] sm:$0xfe]  ;;  %v2120_v37 = vld [vmem:[#allocation10 + $0x258] sm:$0xff] }
 0x368   : > { %2907 = vmatpush3.msra.mxu0 %v1781_v36  ;;  %v2136_v36 = vld [vmem:[#allocation10 + $0x2d8] sm:$0xff]  ;;  %v1777_v26 = vld [vmem:[#allocation2 + $0x30] sm:$0xff] }
 0x369   : > { %1713 = vrot.lane.b32.xlu1 %v1707_v38, %s3558_s9  ;;  %1715 = vrot.lane.b32.xlu0 %v1708_v39, %s3558_s9  ;;  %s2230_s9 = sld [smem:[#allocation3]] }
 0x392   : > { %s3185_s22 = spop %3184 }
 0x393   : > { %v1723_v55 = vstv %s3185_s22 }
 0x394   : > { %vm4017_vm9 = vcmp.eq.s32.totalorder %v1723_v55, 1  ;;  %v1843_v55 = vrot.slane %v1817_v35, 1 }
 0x3cb   : > { %v1674_v54 = vpop.permute.xlu1 %1673 }
 0x3cc   : > { %v1681_v42 = vmax.f32 %v3991_v60, %v1674_v54 }
 0x3cf   : > { %v1710_v40 = vpop.permute.xlu1 %1709  ;;  %v1676_v41 = vpop.permute.xlu0 %1675 }
 0x3d0   : > { %v1717_v43 = vmax.f32 %v3999_v8, %v1710_v40  ;;  %v1682_v47 = vmax.f32 %v3996_v7, %v1676_v41  ;;  %v1773_v7 = vld [vmem:[#allocation2] sm:$0xff] }
 0x3d2   : > { %v1725_v58 = vsel %vm4017_vm9, %v1681_v42, %v1717_v43 }
 0x3d3   : > { %v1755_v59 = vrot.slane %v1725_v58, 7  ;;  %v1712_v45 = vpop.permute.xlu0 %1711  ;;  %v1819_v58 = vld [vmem:[#allocation2 + $0x50] sm:$0x1] }
 0x3d4   : > { %v1718_v48 = vmax.f32 %v1706_v18, %v1712_v45  ;;  %v1835_v18 = vsel %vm582_vm2, %v1833_v63, %v1834_v1  ;;  %v2134_v45 = vld [vmem:[#allocation10 + $0x2c8] sm:$0xff]  ;;  %v2117_v63 = vld [vmem:[#allocation10 + $0x240] sm:$0xff] }
 0x3d5   : > { %1767 = vst [vmem:[#allocation2 + $0x8] sm:$0xfe] %v1755_v59 }
 0x3d6   : > { %v1726_v50 = vsel %vm4017_vm9, %v1682_v47, %v1718_v48 }
 0x3d7   : > { %v1756_v51 = vrot.slane %v1726_v50, 7  ;;  %v1678_v52 = vpop.permute.xlu1 %1677  ;;  %v1680_v56 = vpop.permute.xlu0 %1679 }
 0x3d8   : > { %v1683_v2 = vmax.f32 %v1671_v53, %v1678_v52  ;;  %v1684_v3 = vmax.f32 %v1672_v32, %v1680_v56  ;;  %v1840_v53 = vsel %vm582_vm2, %v1834_v1, %v1839_v22  ;;  %v2137_v32 = vld [vmem:[#allocation10 + $0x2e0] sm:$0xff]  ;;  %v2118_v52 = vld [vmem:[#allocation10 + $0x248] sm:$0xff]  ;;  %v2111_v1 = vld [vmem:[#allocation10 + $0x210] sm:$0xff] }
 0x3d9   : > { %v4027_v60 = vsel %vm531_vm1, %v1755_v59, %v1756_v51  ;;  %1769 = vst [vmem:[#allocation2 + $0x28] sm:$0x1] %v1756_v51  ;;  %v1844_v59 = vrot.slane %v3931_v27, 1  ;;  %v1849_v51 = vrot.slane %v1819_v58, 1  ;;  %v3330_v58 = vld [vmem:[%s4193_s11 + $0x20] sm:$0xff]  }
 0x3da   : > { %v1837_v8 = vrot.slane %v4027_v60, 1 }
 0x3db   : > { %v1714_v61 = vpop.permute.xlu1 %1713  ;;  %v1716_v62 = vpop.permute.xlu0 %1715  ;;  %v1845_v50 = vsel %vm582_vm2, %v1843_v55, %v1844_v59 }
 0x3dc   : > { %v1719_v4 = vmax.f32 %v1707_v38, %v1714_v61  ;;  %v1720_v5 = vmax.f32 %v1708_v39, %v1716_v62  ;;  %v1774_v6 = vld [vmem:[#allocation2 + $0x8] sm:$0xff]  ;;  %v2135_v38 = vld [vmem:[#allocation10 + $0x2d0] sm:$0xff]  ;;  %v2084_v62 = vrot.slane %v4027_v60, 2 }
 0x3dd   : > { %v1814_v46 = vld [vmem:[#allocation2 + $0x8] sm:$0xfe]  ;;  %2043 = vmatprep.mubr.f32.mxu0 %v1774_v6  ;;  %v2131_v6 = vld [vmem:[#allocation10 + $0x2b0] sm:$0xff] }
 0x3de   : > { %v1836_v9 = vrot.slane %v1814_v46, 1  ;;  %v1727_v12 = vsel %vm4017_vm9, %v1683_v2, %v1719_v4  ;;  %v1728_v13 = vsel %vm4017_vm9, %v1684_v3, %v1720_v5  ;;  %2044 = vmatmul.mubr.f32.vlgmr.msra.gmra.mxu0 %v1773_v7  ;;  %v2065_v47 = vld [vmem:[#allocation2 + $0x8] sm:$0xfc]  ;;  %v1850_v2 = vsel %vm582_vm2, %v1844_v59, %v1849_v51  ;;  %v2132_v3 = vld [vmem:[#allocation10 + $0x2b8] sm:$0xff]  ;;  %v2115_v46 = vld [vmem:[#allocation10 + $0x230] sm:$0xff] }
 0x3df   : > { %v1758_v14 = vrot.slane %v1727_v12, 7  ;;  %v1759_v15 = vrot.slane %v1728_v13, 7  ;;  %2048 = vmatprep.mubr.f32.mxu0 %v4027_v60  ;;  %v2083_v61 = vrot.slane %v2065_v47, 2  ;;  %v2116_v5 = vld [vmem:[#allocation10 + $0x238] sm:$0xff]  ;;  %v2130_v7 = vld [vmem:[#allocation10 + $0x2a8] sm:$0xff]  ;;  %v2129_v60 = vld [vmem:[#allocation10 + $0x2a0] sm:$0xff] }
 0x3e0   : > { %v1838_v49 = vsel %vm582_vm2, %v1836_v9, %v1837_v8  ;;  %v1816_v19 = vld [vmem:[#allocation2 + $0x28] sm:$0x1]  ;;  %v2113_v9 = vld [vmem:[#allocation10 + $0x220] sm:$0xff]  ;;  %v2112_v12 = vld [vmem:[#allocation10 + $0x218] sm:$0xff] }
 0x3e1   : > { %1958 = vmatprep.mubr.f32.mxu1 %v1838_v49  ;;  %1770 = vst [vmem:[#allocation2 + $0x38] sm:$0xfe] %v1758_v14  ;;  %v4039_v23 = vsel %vm531_vm1, %v1758_v14, %v1759_v15  ;;  %1772 = vst [vmem:[#allocation2 + $0x58] sm:$0x1] %v1759_v15  ;;  %v1841_v25 = vrot.slane %v1816_v19, 1  ;;  %v2085_v4 = vsel %vm818_vm3, %v2083_v61, %v2084_v62  ;;  %v2127_v13 = vld [vmem:[#allocation10 + $0x290] sm:$0xff] }
 0x3e2   : > { %1959 = vmatmul.mubr.f32.vlgmr.msra.gmra.mxu1 %v1835_v18  ;;  %2049 = vmatmul.mubr.f32.gmra.mxu0 %v3940_v33  ;;  %v1847_v41 = vrot.slane %v4039_v23, 1  ;;  %v2064_v14 = vld [vmem:[#allocation2] sm:$0xfc]  ;;  %v2126_v15 = vld [vmem:[#allocation10 + $0x288] sm:$0xff]  ;;  %v3332_v51 = vld [vmem:[%s4193_s11 + $0x10] sm:$0xff]  }
 0x3e3   : > { %2921 = vmatpush3.msra.mxu1 %v2124_v16  ;;  %v1842_v30 = vsel %vm582_vm2, %v1837_v8, %v1841_v25  ;;  %v2114_v8 = vld [vmem:[#allocation10 + $0x228] sm:$0xff]  ;;  %v2125_v18 = vld [vmem:[#allocation10 + $0x280] sm:$0xff]  ;;  %v2080_v19 = vrot.slane %v2064_v14, 2 }
 0x3e4   : > { %2922 = vmatprep.subr.mxu1 %v2139_v20  ;;  %1963 = vmatprep.mubr.f32.mxu1 %v1842_v30  ;;  %v2067_v49 = vld [vmem:[#allocation2 + $0x28] sm:$0x3]  ;;  %v2109_v20 = vld [vmem:[#allocation10 + $0x200] sm:$0xff] }
 0x3e5   : > { %2923 = vmatpush3.msra.mxu1 %v2123_v28  ;;  %v2110_v16 = vld [vmem:[#allocation10 + $0x208] sm:$0xff]  ;;  %v2088_v22 = vrot.slane %v2067_v49, 2  ;;  %v2066_v25 = vld [vmem:[#allocation2 + $0x20] sm:$0x3]  ;;  %v3327_v28 = vld [vmem:[%s4193_s11 + $0x38] sm:$0xff]  }
 0x3e6   : > { %2924 = vmatprep.subr.mxu1 %v2138_v29  ;;  %1964 = vmatmul.mubr.f32.gmra.mxu1 %v1840_v53  ;;  %v2081_v29 = vrot.slane %v3940_v33, 2  ;;  %v2094_v33 = vrot.slane %v4039_v23, 2  ;;  %v3335_v49 = vld [vmem:[%s4193_s11 + $0x78] sm:$0xff]  }
 0x3e7   : > { %2925 = vmatpush3.msra.mxu1 %v2122_v31  ;;  %v3328_v31 = vld [vmem:[%s4193_s11 + $0x30] sm:$0xff]   ;;  %3144 = vmatprep.subr.bf16.mxu0 %v3335_v49 }
 0x3e8   : > { %2926 = vmatprep.subr.mxu1 %v2137_v32  ;;  %v1778_v39 = vld [vmem:[#allocation2 + $0x38] sm:$0xff]  ;;  %v2082_v53 = vsel %vm818_vm3, %v2080_v19, %v2081_v29  ;;  %v2086_v32 = vrot.slane %v2066_v25, 2  ;;  %3145 = vmatpush3.bf16.msra.mxu0 %v3335_v49  ;;  %v3338_v19 = vld [vmem:[%s4193_s11 + $0x60] sm:$0xff]   ;;  %v3341_v25 = vld [vmem:[%s4193_s11 + $0x48] sm:$0xff]  }
 0x3e9   : > { %2927 = vmatpush3.msra.mxu1 %v2121_v34  ;;  %v1818_v54 = vld [vmem:[#allocation2 + $0x38] sm:$0xfe]  ;;  %v1820_v40 = vld [vmem:[#allocation2 + $0x58] sm:$0x1]  ;;  %2053 = vmatprep.mubr.f32.mxu0 %v1778_v39  ;;  %v2089_v34 = vsel %vm818_vm3, %v2084_v62, %v2088_v22  ;;  %v3560_v62 = vmov 1966171168  }
 0x3ea   : > { %v1846_v42 = vrot.slane %v1818_v54, 1  ;;  %2928 = vmatprep.subr.mxu1 %v2136_v36  ;;  %v1851_v43 = vrot.slane %v1820_v40, 1  ;;  %2054 = vmatmul.mubr.f32.gmra.mxu0 %v1777_v26  ;;  %v2069_v30 = vld [vmem:[#allocation2 + $0x38] sm:$0xfc]  ;;  %v2068_v36 = vld [vmem:[#allocation2 + $0x30] sm:$0xfc]  ;;  %v2087_v39 = vsel %vm818_vm3, %v2081_v29, %v2086_v32 }
 0x3eb   : > { %2929 = vmatpush3.msra.mxu1 %v2120_v37  ;;  %2058 = vmatprep.mubr.f32.mxu0 %v4039_v23  ;;  %v2093_v35 = vrot.slane %v2069_v30, 2  ;;  %v2071_v26 = vld [vmem:[#allocation2 + $0x58] sm:$0x3]  ;;  %v2702_v37 = vld [vmem:[%s4190_s8] ss:$0 sm:$0xff]  ;;  %v2090_v54 = vrot.slane %v2068_v36, 2 }
 0x3ec   : > { %v1848_v48 = vsel %vm582_vm2, %v1846_v42, %v1847_v41  ;;  %2930 = vmatprep.subr.mxu1 %v2135_v38  ;;  %v1852_v56 = vsel %vm582_vm2, %v1847_v41, %v1851_v43  ;;  %v3329_v38 = vld [vmem:[%s4193_s11 + $0x28] sm:$0xff]   ;;  %v2098_v41 = vrot.slane %v2071_v26, 2  ;;  %v2070_v42 = vld [vmem:[#allocation2 + $0x50] sm:$0x3]  ;;  %v2091_v23 = vrot.slane %v3931_v27, 2 }
 0x3ed   : > { %1968 = vmatprep.mubr.f32.mxu1 %v1848_v48  ;;  %2931 = vmatpush3.msra.mxu1 %v2119_v44  ;;  %v2095_v40 = vsel %vm818_vm3, %v2093_v35, %v2094_v33  ;;  %v2096_v47 = vrot.slane %v2070_v42, 2  ;;  %v3340_v22 = vld [vmem:[%s4193_s11 + $0x50] sm:$0xff]  }
 0x3ee   : > { %1969 = vmatmul.mubr.f32.gmra.mxu1 %v1845_v50  ;;  %2932 = vmatprep.subr.mxu1 %v2134_v45  ;;  %v2092_v45 = vsel %vm818_vm3, %v2090_v54, %v2091_v23  ;;  %v2099_v48 = vsel %vm818_vm3, %v2094_v33, %v2098_v41 }
 0x3ef   : > { %2059 = vmatmul.mubr.f32.gmra.mxu0 %v3931_v27  ;;  %1973 = vmatprep.mubr.f32.mxu1 %v1852_v56  ;;  %v3331_v27 = vld [vmem:[%s4193_s11 + $0x18] sm:$0xff]   ;;  %v2097_v50 = vsel %vm818_vm3, %v2091_v23, %v2096_v47 }
 0x3f0   : > { %2933 = vmatpush3.msra.mxu1 %v2118_v52  ;;  %v3333_v52 = vld [vmem:[%s4193_s11 + $0x8] sm:$0xff]  }
 0x3f1   : > { %2934 = vmatprep.subr.mxu1 %v2133_v57  ;;  %v3334_v57 = vld [vmem:[%s4193_s11] sm:$0xff]  }
 0x3f2   : > { %1974 = vmatmul.mubr.f32.gmra.mxu1 %v1850_v2 }
 0x3f3   : > { %2205 = vmatprep.mubr.f32.mxu1 %v2085_v4  ;;  %2935 = vmatpush3.msra.mxu1 %v2117_v63  ;;  %v1609_v63 = vunpack.c.l.s4 %v3560_v62 }
 0x3f4   : > { %2936 = vmatprep.subr.mxu1 %v2132_v3  ;;  %v1612_v3 = vshrl.u32 %v508_v0, 7 }
 0x3f5   : > { %2937 = vmatpush3.msra.mxu1 %v2116_v5  ;;  %v1610_v2 = vunpack.c.0.s8 %v1609_v63 }
 0x3f6   : > { %2938 = vmatprep.subr.mxu1 %v2131_v6 }
 0x3f7   : > { %2939 = vmatpush3.msra.mxu1 %v2115_v46  ;;  %v1613_v4 = vsub.s32 %v1610_v2, %v1612_v3  ;;  %v1632_v46 = vsub.s32 0, %v1612_v3 }
 0x3f8   : > { %2940 = vmatprep.subr.mxu1 %v2130_v7 }
 0x3f9   : > { %2941 = vmatpush3.msra.mxu1 %v2114_v8 }
 0x3fa   : > { %2942 = vmatprep.subr.mxu1 %v2129_v60 }
 0x3fb   : > { %2943 = vmatpush3.msra.mxu1 %v2113_v9 }
 0x3fc   : > { %2944 = vmatprep.subr.mxu1 %v2128_v10 }
 0x3fd   : > { %2945 = vmatpush3.msra.mxu1 %v2112_v12 }
 0x3fe   : > { %2946 = vmatprep.subr.mxu1 %v2127_v13 }
 0x3ff   : > { %2947 = vmatpush3.msra.mxu1 %v2111_v1 }
 0x400   : > { %2948 = vmatprep.subr.mxu1 %v2126_v15 }
 0x401   : > { %2949 = vmatpush3.msra.mxu1 %v2110_v16  ;;  %v3336_v16 = vld [vmem:[%s4193_s11 + $0x70] sm:$0xff]  }
 0x402   : > { %2950 = vmatprep.subr.mxu1 %v2125_v18  ;;  %3146 = vmatprep.subr.bf16.mxu0 %v3336_v16  ;;  %v3337_v18 = vld [vmem:[%s4193_s11 + $0x68] sm:$0xff]  }
 0x403   : > { %2951 = vmatpush3.msra.mxu1 %v2109_v20  ;;  %3147 = vmatpush3.bf16.msra.mxu0 %v3336_v16  ;;  %v3339_v20 = vld [vmem:[%s4193_s11 + $0x58] sm:$0xff]  }
 0x404   : > { %2206 = vmatmul.mubr.f32.vlgmr.msra.gmra.mxu1 %v2082_v53  ;;  %3164 = vmatprep.subr.bf16.mxu1 %v3327_v28 }
 0x405   : > { %2210 = vmatprep.mubr.f32.mxu1 %v2089_v34  ;;  %3165 = vmatpush3.bf16.msra.mxu1 %v3327_v28  ;;  %v3342_v28 = vld [vmem:[%s4193_s11 + $0x40] sm:$0xff]  }
 0x406   : > { %3166 = vmatprep.subr.bf16.mxu1 %v3328_v31  ;;  %3148 = vmatprep.subr.bf16.mxu0 %v3337_v18 }
 0x407   : > { %v1597_v55 = vpop.f32.mrf.mxu0  ;;  %3149 = vmatpush3.bf16.msra.mxu0 %v3337_v18 }
 0x408   : > { %2211 = vmatmul.mubr.f32.gmra.mxu1 %v2087_v39  ;;  %v1598_v43 = vadd.f32 %v2702_v37, %v1597_v55  ;;  %3150 = vmatprep.subr.bf16.mxu0 %v3338_v19 }
 0x409   : > { %2215 = vmatprep.mubr.f32.mxu1 %v2095_v40  ;;  %3167 = vmatpush3.bf16.msra.mxu1 %v3328_v31  ;;  %v3143_v44 = vpop.f32.mrf.mxu0 }
 0x40a   : > { %3168 = vmatprep.subr.bf16.mxu1 %v3329_v38  ;;  %v2705_v59 = vmul.f32 -1.442695, %v1598_v43 }
 0x40b   : > { %3151 = vmatpush3.bf16.msra.mxu0 %v3338_v19 }
 0x40c   : > { %2216 = vmatmul.mubr.f32.gmra.mxu1 %v2092_v45  ;;  %3343 = vpow2.f32 %v2705_v59  ;;  %3152 = vmatprep.subr.bf16.mxu0 %v3339_v20 }
 0x40d   : > { %2220 = vmatprep.mubr.f32.mxu1 %v2099_v48  ;;  %3169 = vmatpush3.bf16.msra.mxu1 %v3329_v38 }
 0x40e   : > { %3170 = vmatprep.subr.bf16.mxu1 %v3330_v58 }
 0x40f   : > { %3153 = vmatpush3.bf16.msra.mxu0 %v3339_v20 }
 0x410   : > { %2221 = vmatmul.mubr.f32.gmra.mxu1 %v2097_v50  ;;  %3154 = vmatprep.subr.bf16.mxu0 %v3340_v22 }
 0x411   : > { %3171 = vmatpush3.bf16.msra.mxu1 %v3330_v58  ;;  %v2231_v58 = vstv %s2230_s9 }
 0x412   : > { %3172 = vmatprep.subr.bf16.mxu1 %v3331_v27 }
 0x413   : > { %3155 = vmatpush3.bf16.msra.mxu0 %v3340_v22 }
 0x414   : > { %3156 = vmatprep.subr.bf16.mxu0 %v3341_v25 }
 0x415   : > { %3173 = vmatpush3.bf16.msra.mxu1 %v3331_v27 }
 0x416   : > { %3174 = vmatprep.subr.bf16.mxu1 %v3332_v51 }
 0x417   : > { %3157 = vmatpush3.bf16.msra.mxu0 %v3341_v25 }
 0x418   : > { %3158 = vmatprep.subr.bf16.mxu0 %v3342_v28 }
 0x419   : > { %3175 = vmatpush3.bf16.msra.mxu1 %v3332_v51  ;;  %v3344_v56 = vpop.eup %3343 }
 0x41a   : > { %3176 = vmatprep.subr.bf16.mxu1 %v3333_v52  ;;  %v1604_v61 = vadd.f32 1.0, %v3344_v56 }
 0x41b   : > { %3159 = vmatpush3.bf16.msra.mxu0 %v3342_v28 }
 0x41c   : > { %3345 = vrcp.f32 %v1604_v61 }
 0x41d   : > { %3177 = vmatpush3.bf16.msra.mxu1 %v3333_v52 }
 0x41e   : > { %3178 = vmatprep.subr.bf16.mxu1 %v3334_v57 }
 0x421   : > { %3179 = vmatpush3.bf16.msra.mxu1 %v3334_v57 }
 0x429   : > { %v3346_v5 = vpop.eup %3345 }
 0x42a   : > { %v1614_v6 = vrot.slane %v3346_v5, %v1613_v4 }
 0x42c   : > { %v1615_v7 = vcombine.high %v1614_v6, %v1614_v6  ;;  %v1622_v8 = vrot.slane %v1614_v6, %v1613_v4 }
 0x42e   : > { %v1629_v60 = vrot.slane %v1615_v7, %v1613_v4  ;;  %v1633_v9 = vrot.slane %v1622_v8, %v1632_v46 }
 0x430   : > { %v1637_v10 = vrot.slane %v1629_v60, %v1632_v46  ;;  %v1640_v12 = vmul.f32 %v1633_v9, %v3917_v17  ;;  %v1641_v13 = vmul.f32 %v1633_v9, %v3926_v24 }
 0x432   : > { %v2264_v1 = vpack.c.bf16 %v1641_v13, %v1640_v12  ;;  %v1642_v14 = vmul.f32 %v1637_v10, %v3914_v11  ;;  %v1643_v15 = vmul.f32 %v1637_v10, %v3920_v21 }
 0x434   : > { %3180 = vmatprep.mubr.bf16.mxu1 %v2264_v1  ;;  %v2265_v0 = vpack.c.bf16 %v1643_v15, %v1642_v14 }
 0x436   : > { %3181 = vmatmul.mubr.bf16.vlgmr.msra.gmra.mxu1 %v2265_v0 }
 0x49e   : > { %v2908_v53 = vpop.f32.mrf.mxu0 }
 0x4a0   : > { %v2909_v35 = vpop.f32.mrf.mxu0 }
 0x4a1   : > { %v2910_v40 = vadd.f32 %v2909_v35, %v2908_v53 }
 0x4a2   : > { %v2864_v29 = vpop.f32.mrf.mxu1  ;;  %v2911_v26 = vpop.f32.mrf.mxu0 }
 0x4a4   : > { %v2865_v30 = vpop.f32.mrf.mxu1  ;;  %v2912_v37 = vpop.f32.mrf.mxu0 }
 0x4a5   : > { %v2866_v54 = vadd.f32 %v2865_v30, %v2864_v29  ;;  %v2913_v45 = vadd.f32 %v2912_v37, %v2911_v26 }
 0x4a6   : > { %v2867_v31 = vpop.f32.mrf.mxu1 }
 0x4a7   : > { %v2046_v43 = vadd.f32 %v2910_v40, %v2866_v54  ;;  %v2508_v40 = vld [vmem:[%s3784_s1 + $0x10] sm:$0xff] }
 0x4a8   : > { %v2868_v32 = vpop.f32.mrf.mxu1 }
 0x4a9   : > { %v2869_v23 = vadd.f32 %v2868_v32, %v2867_v31 }
 0x4aa   : > { %v2914_v38 = vpop.f32.mrf.mxu0 }
 0x4ab   : > { %v2051_v51 = vadd.f32 %v2913_v45, %v2869_v23  ;;  %v2509_v45 = vld [vmem:[%s3784_s1 + $0x18] sm:$0xff] }
 0x4ac   : > { %v2915_v41 = vpop.f32.mrf.mxu0 }
 0x4ad   : > { %v2916_v57 = vadd.f32 %v2915_v41, %v2914_v38 }
 0x4ae   : > { %v2870_v34 = vpop.f32.mrf.mxu1 }
 0x4af   : > { %v2917_v48 = vpop.f32.mrf.mxu0 }
 0x4b0   : > { %v2871_v36 = vpop.f32.mrf.mxu1 }
 0x4b1   : > { %v2872_v27 = vadd.f32 %v2871_v36, %v2870_v34  ;;  %v2918_v3 = vpop.f32.mrf.mxu0 }
 0x4b2   : > { %v2873_v33 = vpop.f32.mrf.mxu1  ;;  %v2919_v8 = vadd.f32 %v2918_v3, %v2917_v48 }
 0x4b3   : > { %v2056_v2 = vadd.f32 %v2916_v57, %v2872_v27 }
 0x4b4   : > { %v2874_v39 = vpop.f32.mrf.mxu1 }
 0x4b5   : > { %v2875_v5 = vadd.f32 %v2874_v39, %v2873_v33 }
 0x4b7   : > { %v2061_v12 = vadd.f32 %v2919_v8, %v2875_v5 }
 0x4c4   : > { %v2952_v55 = vpop.f32.mrf.mxu1 }
 0x4c6   : > { %v2953_v42 = vpop.f32.mrf.mxu1 }
 0x4c7   : > { %v2954_v44 = vadd.f32 %v2953_v42, %v2952_v55 }
 0x4c8   : > { %v2955_v59 = vpop.f32.mrf.mxu1 }
 0x4c9   : > { %v2226_v47 = vadd.f32 %v2954_v44, %v2046_v43 }
 0x4ca   : > { %v2956_v50 = vpop.f32.mrf.mxu1 }
 0x4cb   : > { %v2232_v52 = vadd.f32 %v2231_v58, %v2226_v47  ;;  %v2957_v56 = vadd.f32 %v2956_v50, %v2955_v59 }
 0x4cc   : > { %v2958_v61 = vpop.f32.mrf.mxu1 }
 0x4cd   : > { %v2706_v62 = vmul.f32 -1.442695, %v2232_v52  ;;  %v2227_v63 = vadd.f32 %v2957_v56, %v2051_v51  ;;  %v2507_v51 = vld [vmem:[%s3784_s1 + $0x8] sm:$0xff] }
 0x4ce   : > { %v2959_v4 = vpop.f32.mrf.mxu1 }
 0x4cf   : > { %3347 = vpow2.f32 %v2706_v62  ;;  %v2233_v6 = vadd.f32 %v2231_v58, %v2227_v63  ;;  %v2960_v46 = vadd.f32 %v2959_v4, %v2958_v61 }
 0x4d0   : > { %v2961_v7 = vpop.f32.mrf.mxu1 }
 0x4d1   : > { %v2707_v60 = vmul.f32 -1.442695, %v2233_v6  ;;  %v2228_v9 = vadd.f32 %v2960_v46, %v2056_v2 }
 0x4d2   : > { %v2962_v10 = vpop.f32.mrf.mxu1 }
 0x4d3   : > { %3349 = vpow2.f32 %v2707_v60  ;;  %v2234_v13 = vadd.f32 %v2231_v58, %v2228_v9  ;;  %v2963_v1 = vadd.f32 %v2962_v10, %v2961_v7 }
 0x4d5   : > { %v2708_v14 = vmul.f32 -1.442695, %v2234_v13  ;;  %v2229_v15 = vadd.f32 %v2963_v1, %v2061_v12 }
 0x4d7   : > { %3351 = vpow2.f32 %v2708_v14  ;;  %v2235_v0 = vadd.f32 %v2231_v58, %v2229_v15 }
 0x4d9   : > { %v2709_v49 = vmul.f32 -1.442695, %v2235_v0 }
 0x4db   : > { %3353 = vpow2.f32 %v2709_v49 }
 0x4dc   : > { %v3348_v16 = vpop.eup %3347 }
 0x4dd   : > { %v2248_v18 = vadd.f32 1.0, %v3348_v16 }
 0x4df   : > { %3355 = vrcp.f32 %v2248_v18 }
 0x4e0   : > { %v3350_v19 = vpop.eup %3349 }
 0x4e1   : > { %v2249_v20 = vadd.f32 1.0, %v3350_v19 }
 0x4e3   : > { %3357 = vrcp.f32 %v2249_v20 }
 0x4e4   : > { %v3352_v22 = vpop.eup %3351 }
 0x4e5   : > { %v2250_v25 = vadd.f32 1.0, %v3352_v22 }
 0x4e7   : > { %3359 = vrcp.f32 %v2250_v25 }
 0x4e8   : > { %v3354_v28 = vpop.eup %3353 }
 0x4e9   : > { %v2251_v29 = vadd.f32 1.0, %v3354_v28 }
 0x4eb   : > { %3361 = vrcp.f32 %v2251_v29 }
 0x4ec   : > { %v3356_v30 = vpop.eup %3355 }
 0x4ed   : > { %v2260_v53 = vmul.f32 %v3356_v30, %v3917_v17  ;;  %v2742_v17 = vld [vmem:[%s4194_s12] ss:$0 sm:$0xff] }
 0x4f0   : > { %v3358_v31 = vpop.eup %3357 }
 0x4f1   : > { %v2261_v32 = vmul.f32 %v3358_v31, %v3926_v24 }
 0x4f3   : > { %v2282_v34 = vpack.c.bf16 %v2261_v32, %v2260_v53 }
 0x4f4   : > { %v3360_v35 = vpop.eup %3359 }
 0x4f5   : > { %3160 = vmatprep.mubr.bf16.mxu0 %v2282_v34  ;;  %v2262_v26 = vmul.f32 %v3360_v35, %v3914_v11 }
 0x4f6   : > { %v3182_v38 = vpop.f32.mrf.mxu1 }
 0x4f8   : > { %v3362_v36 = vpop.eup %3361  ;;  %v2480_v39 = vpop.f32.mrf.mxu1 }
 0x4f9   : > { %v2263_v33 = vmul.f32 %v3362_v36, %v3920_v21  ;;  %v2506_v21 = vld [vmem:[%s3784_s1] sm:$0xff]  ;;  %s3473_s1 = sshll.u32 %s3561_s10, 4  ;;  %s3474_s1 = int_to_ptr.vmem [resolvable:$false] %s3473_s1 }
 0x4fa   : > { %v3183_v55 = vpop.f32.mrf.mxu1  ;;  %s3475_s19 = scalar_lea.vmem %s3474_s1, 1024  ;;  %p3476_p5 = scmp.lt.s32.totalorder %s4134_s15, %s3474_s1 }
 0x4fb   : > { %v2283_v37 = vpack.c.bf16 %v2263_v33, %v2262_v26  ;;  %p3477_p3 = scmp.lt.s32.totalorder %s3475_s19, %s3469_s21 }
 0x4fc   : > { %v2483_v59 = vpop.f32.mrf.mxu1 }
 0x4fd   : > { %3161 = vmatmul.mubr.bf16.vlgmr.msra.gmra.mxu0 %v2283_v37  ;;  %p3478_p7 = por %p3477_p3, %p3476_p5 }
 0x4ff   : > { %p3479_p9 = pnand %p3478_p7, %p3472_p0 }
 0x5bd   : > { %v3162_v54 = vpop.f32.mrf.mxu0 }
 0x5be   : > { %v2489_v24 = vadd.f32 %v3182_v38, %v3162_v54 }
 0x5bf   : > { %v2383_v41 = vpop.f32.mrf.mxu0 }
 0x5c0   : > { %v2504_v42 = vadd.f32 %v2742_v17, %v2489_v24  ;;  %v2481_v11 = vadd.f32 %v2480_v39, %v2383_v41 }
 0x5c1   : > { %v3163_v43 = vpop.f32.mrf.mxu0 }
 0x5c2   : > { %v2512_v23 = vadd.f32 %v2508_v40, %v2504_v42  ;;  %v2502_v44 = vadd.f32 %v2742_v17, %v2481_v11  ;;  %v2492_v58 = vadd.f32 %v3183_v55, %v3163_v43 }
 0x5c3   : > { %v2386_v47 = vpop.f32.mrf.mxu0 }
 0x5c4   : > { %2516 = vst [vmem:[%s504_s3 + $0x10] sm:$0xff] %v2512_v23  ;;  %v2510_v48 = vadd.f32 %v2506_v21, %v2502_v44  ;;  %v2505_v27 = vadd.f32 %v2742_v17, %v2492_v58  ;;  %v2484_v50 = vadd.f32 %v2483_v59, %v2386_v47 }
 0x5c6   : > { %2514 = vst [vmem:[%s504_s3] sm:$0xff] %v2510_v48  ;;  %v2513_v52 = vadd.f32 %v2509_v45, %v2505_v27  ;;  %v2503_v56 = vadd.f32 %v2742_v17, %v2484_v50 }
 0x5c8   : > { %2517 = vst [vmem:[%s504_s3 + $0x18] sm:$0xff] %v2513_v52  ;;  %v2511_v57 = vadd.f32 %v2507_v51, %v2503_v56 }
 0x5ca   : > { %2515 = vst [vmem:[%s504_s3 + $0x8] sm:$0xff] %v2511_v57 }
 0x5cb   : > { %3482 = shalt.err (!%p3479_p9)
}
 0x5cc   : > { %s3483_s18 = scalar_lea.hbm %s4139_s23, 512  ;;  %s3487_s24 = scalar_lea.hbm %s4195_s13, 1024 }
 0x5cd   : > { %p3484_p1 = scmp.ne.s32.totalorder %s4139_s23, %s3483_s18  ;;  %p3488_p11 = scmp.lt.s32.totalorder %s4139_s23, %s4195_s13 }
 0x5ce   : > { %p3489_p13 = scmp.lt.s32.totalorder %s3487_s24, %s3483_s18 }
 0x5cf   : > { %p3485_p8 = pnand %p3484_p1, %p4230_p6 }
 0x5d0   : > { %p3490_p2 = por %p3489_p13, %p3488_p11 }
 0x5d1   : > { %p3486_p10 = pneg %p3485_p8 }
 0x5d3   : > { %p3491_p4 = pnand %p3490_p2, %p3486_p10 }
 0x5d5   : > { %3494 = shalt.err (!%p3491_p4)
}
 0x5d6   : > { %s3562_s29 = smov 128   ;;  %s3563_s16 = smov 8  }
 0x5d7   : > { %3200 = dma.vmem_to_hbm [thread:$0]  (%p4230_p6), %s4134_s15, 512, %s4139_s23, %s2519_s26, %s3562_s29, %s3562_s29, %s3563_s16  }
 0x5d8 PF: > { %s4231_s21 = sld [smem:[#allocation18_spill]]  ;;  %s2548_s10 = sand.u32 1, %s3529_s27  }
 0x5d9   : > { %p4233_p0 = scmp.ge.s32.totalorder %s3541_s30, 2  ;;  %s2549_s1 = scalar_lea.sflag [#allocation6], %s2548_s10 }
 0x5de   : > { %p4232_p12 = scmp.ne.s32.totalorder %s4231_s21, 0 }
 0x5e0   : > { %p3217_p5 = pnand %p4233_p0, %p4232_p12 }
 0x5e2   : > { %p3218_p3 = pneg %p3217_p5 }
 0x5e4   : > { %3524 = dma.done.wait (%p3218_p3), %s2549_s1, 512  }
 0x5e5   : > { %3526 = vsyncadd (%p3218_p3), %s2549_s1, 4294966784  ;;  %s4234_s19 = sld [smem:[#allocation17_spill]]  ;;  %p29_p7 = scmp.ge.s32.totalorder %s3720_s14, 4  }
 0x5e6   : > { %s4235_s29 = sld [smem:[#allocation19_spill]]  ;;  %s4236_s27 = smov %s3533_s28 }
 0x5e7   : > { %s4238_s30 = smov %s3720_s14  ;;  %31 = sbr.rel (!%p29_p7) target bundleno = 12 (0xc), region = 139 }
 0x5eb   : > { %s4237_s28 = smov %s4234_s19 }
 0x5ec   :  { %2554 = vsyncpa [#allocation5], 1 }
 0x5ed   :  { %2556 = vsyncpa [#allocation5 + $0x1], 1 }
 0x5ee   :  { %2557 = vsyncpa [#allocation8], 1 }
 0x5ef   :  { %2558 = vsyncpa [#allocation11], 1 }
 0x5f0   :  { %2559 = vsyncpa [#allocation6], 1 }
 0x5f1   :  { %2561 = vsyncpa [#allocation6 + $0x1], 1 }

</bundles_post_ra>
